<compile_context>
chip_gen: v7x
topology: tpu7x:2x2x1
jax: 0.10.0
libtpu: 0.0.40
codegen_flags: <defaults>
</compile_context>

<pallas_src>
import functools

import jax
import jax.numpy as jnp
import numpy as np
from jax import lax
from jax.experimental import pallas as pl
from jax.experimental.pallas import tpu as pltpu


def _round_up(x, m):
    return (x + m - 1) // m * m


def _largest_divisor_leq(n, cap):
    for d in range(min(n, cap), 0, -1):
        if n % d == 0:
            return d
    return 1


# --------------------------- Stage 2: recurrence ---------------------------
def _lstm_recurrence_kernel(xg_ref, h0_ref, c0_ref, whg_ref,
                            hseq_ref, h_ref, c_ref, *, tt, hp, compute_dtype):
    """Runs TT LSTM timesteps per grid step.

    xg_ref  : (TT, B, 4*Hp) precomputed x-projection + bias for the gates
    whg_ref : (Hp, 4*Hp)    VMEM-resident gate h-weights
    hseq_ref: (TT, B, Hp)   per-step hidden states (consumed by the head pass)
    h_ref/c_ref: (B, Hp)    resident carry / final state
    """
    @pl.when(pl.program_id(0) == 0)
    def _init():
        h_ref[...] = h0_ref[...]
        c_ref[...] = c0_ref[...]

    whg = whg_ref[...]  # hoist: one VMEM read reused by all unrolled steps

    def step(i, carry):
        h, c = carry
        gates = xg_ref[i] + jnp.dot(h.astype(compute_dtype), whg,
                                    preferred_element_type=jnp.float32)
        # Gate slices are Hp(=128)-aligned -> plain vreg slices.
        f_gate = jax.nn.sigmoid(gates[:, 0 * hp:1 * hp])
        i_gate = jax.nn.sigmoid(gates[:, 1 * hp:2 * hp])
        g_gate = jnp.tanh(gates[:, 2 * hp:3 * hp])
        o_gate = jax.nn.sigmoid(gates[:, 3 * hp:4 * hp])
        c_new = c * f_gate + i_gate * g_gate
        h_new = jnp.tanh(c_new) * o_gate
        hseq_ref[i] = h_new
        return h_new, c_new

    h_fin, c_fin = lax.fori_loop(0, tt, step, (h_ref[...], c_ref[...]),
                                 unroll=True)
    h_ref[...] = h_fin
    c_ref[...] = c_fin


# ----------------------- Stage 3: head + log-softmax -----------------------
def _head_kernel(h_ref, xo_ref, woh_ref, out_ref, *, compute_dtype):
    """logits = xo + h_new @ W_out_h ; log-softmax over lanes.

    Padded output lanes already carry -1e30 via the bias fold, so no masking
    is needed here; exp of those lanes underflows to exactly 0.
    """
    logits = xo_ref[...] + jnp.dot(h_ref[...].astype(compute_dtype),
                                   woh_ref[...],
                                   preferred_element_type=jnp.float32)
    m = jnp.max(logits, axis=-1, keepdims=True)
    lse = m + jnp.log(jnp.sum(jnp.exp(logits - m), axis=-1, keepdims=True))
    out_ref[...] = logits - lse


@functools.partial(jax.jit, static_argnames=("use_bf16",))
def lstm_layer_forward(xs, h0, c0,
                       w_gate_x, w_gate_h, b_gate,
                       w_out_x, w_out_h, b_out,
                       *, use_bf16=False):
    """Apply the LSTMLayer over a sequence xs: (T, B, D_in). Returns
    (log_softmax outputs (T, B, D_out), H_final (B, H), C_final (B, H))."""
    T, B, D_in = xs.shape
    H = h0.shape[1]
    Dout = w_out_x.shape[1]
    Hp = _round_up(H, 128)
    Dp = _round_up(Dout, 128)
    compute_dtype = jnp.bfloat16 if use_bf16 else jnp.float32

    # ---- Pad per-gate so each gate occupies a vreg-aligned [k*Hp,(k+1)*Hp) slab.
    def pad_gate_cols(w):                       # (in, 4*H) -> (in, 4*Hp)
        w4 = w.reshape(w.shape[0], 4, H)
        w4 = jnp.pad(w4, ((0, 0), (0, 0), (0, Hp - H)))
        return w4.reshape(w.shape[0], 4 * Hp)

    wgx = pad_gate_cols(w_gate_x)                                   # (D_in, 4Hp)
    whg = jnp.pad(pad_gate_cols(w_gate_h), ((0, Hp - H), (0, 0)))   # (Hp, 4Hp)
    bg = pad_gate_cols(b_gate)                                      # (1, 4Hp)

    wox = jnp.pad(w_out_x, ((0, 0), (0, Dp - Dout)))                # (D_in, Dp)
    woh = jnp.pad(w_out_h, ((0, Hp - H), (0, Dp - Dout)))           # (Hp, Dp)
    # Fold the padded-lane softmax mask into the head bias (finite, large-neg).
    bo = jnp.pad(b_out, ((0, 0), (0, Dp - Dout)), constant_values=-1e30)

    # ---- Stage 1: time-invariant x-projections + biases, one XLA matmul.
    w_x_fused = jnp.concatenate([wgx, wox], axis=1)                 # (D_in, 4Hp+Dp)
    b_fused = jnp.concatenate([bg, bo], axis=1)                     # (1, 4Hp+Dp)
    xw = jnp.dot(xs.reshape(T * B, D_in), w_x_fused,
                 preferred_element_type=jnp.float32) + b_fused
    xg = xw[:, :4 * Hp].reshape(T, B, 4 * Hp)                       # gate part
    xo = xw[:, 4 * Hp:]                                             # head part (T*B, Dp)

    whg_c = whg.astype(compute_dtype)   # cast once, outside the time loop
    woh_c = woh.astype(compute_dtype)

    h0p = jnp.pad(h0, ((0, 0), (0, Hp - H)))    # padded lanes stay exactly 0
    c0p = jnp.pad(c0, ((0, 0), (0, Hp - H)))

    # ---- Stage 2: serial recurrence, TT timesteps per grid step.
    TT = _largest_divisor_leq(T, 8)
    rec_kernel = functools.partial(_lstm_recurrence_kernel, tt=TT, hp=Hp,
                                   compute_dtype=compute_dtype)
    hseq, h_fin, c_fin = pl.pallas_call(
        rec_kernel,
        out_shape=(jax.ShapeDtypeStruct((T, B, Hp), jnp.float32),
                   jax.ShapeDtypeStruct((B, Hp), jnp.float32),
                   jax.ShapeDtypeStruct((B, Hp), jnp.float32)),
        grid_spec=pltpu.PrefetchScalarGridSpec(
            num_scalar_prefetch=0,
            grid=(T // TT,),
            in_specs=[
                pl.BlockSpec((TT, B, 4 * Hp), lambda g: (g, 0, 0)),  # xg streams
                pl.BlockSpec((B, Hp), lambda g: (0, 0)),             # H0 (resident)
                pl.BlockSpec((B, Hp), lambda g: (0, 0)),             # C0 (resident)
                pl.BlockSpec((Hp, 4 * Hp), lambda g: (0, 0)),        # gate h-weights
            ],
            out_specs=(
                pl.BlockSpec((TT, B, Hp), lambda g: (g, 0, 0)),      # h_t sequence
                pl.BlockSpec((B, Hp), lambda g: (0, 0)),             # resident carry
                pl.BlockSpec((B, Hp), lambda g: (0, 0)),             # resident carry
            ),
        ),
        compiler_params=pltpu.CompilerParams(
            dimension_semantics=("arbitrary",)),   # recurrence -> sequential
    )(xg, h0p, c0p, whg_c)

    # ---- Stage 3: output head + log-softmax, fully parallel over T*B rows.
    N = T * B
    RB = min(128, _round_up(N, 8))
    Np = _round_up(N, RB)
    h_flat = hseq.reshape(N, Hp)
    if Np != N:                       # pad rows; padded rows are discarded
        h_flat = jnp.pad(h_flat, ((0, Np - N), (0, 0)))
        xo = jnp.pad(xo, ((0, Np - N), (0, 0)))

    head_kernel = functools.partial(_head_kernel, compute_dtype=compute_dtype)
    out_p = pl.pallas_call(
        head_kernel,
        out_shape=jax.ShapeDtypeStruct((Np, Dp), jnp.float32),
        grid_spec=pltpu.PrefetchScalarGridSpec(
            num_scalar_prefetch=0,
            grid=(Np // RB,),
            in_specs=[
                pl.BlockSpec((RB, Hp), lambda r: (r, 0)),            # h_new rows
                pl.BlockSpec((RB, Dp), lambda r: (r, 0)),            # xo rows
                pl.BlockSpec((Hp, Dp), lambda r: (0, 0)),            # head h-weights
            ],
            out_specs=pl.BlockSpec((RB, Dp), lambda r: (r, 0)),
        ),
        compiler_params=pltpu.CompilerParams(
            dimension_semantics=("parallel",)),    # megacore-shardable on v7x
    )(h_flat, xo, woh_c)

    out = out_p[:N].reshape(T, B, Dp)[:, :, :Dout]
    return out, h_fin[:, :H], c_fin[:, :H]


def lstm_layer_step(x, h, c, params, use_bf16=False):
    """Single-step API matching the PyTorch module's forward signature."""
    out, h_new, c_new = lstm_layer_forward(x[None], h, c, *params,
                                           use_bf16=use_bf16)
    return out[0], (h_new, c_new)


# ----------------------------- pure-JAX reference -----------------------------
def _reference_step(x, h, c, params, use_bf16=False):
    w_gate_x, w_gate_h, b_gate, w_out_x, w_out_h, b_out = params
    cd = jnp.bfloat16 if use_bf16 else jnp.float32
    H = h.shape[1]

    def hmm(a, w):   # mirrors the in-kernel MXU operand dtype (f32 accumulate)
        return jnp.dot(a.astype(cd), w.astype(cd),
                       preferred_element_type=jnp.float32)

    gates = (jnp.dot(x, w_gate_x, preferred_element_type=jnp.float32)
             + hmm(h, w_gate_h) + b_gate)
    f = jax.nn.sigmoid(gates[:, 0 * H:1 * H])
    i = jax.nn.sigmoid(gates[:, 1 * H:2 * H])
    g = jnp.tanh(gates[:, 2 * H:3 * H])
    o = jax.nn.sigmoid(gates[:, 3 * H:4 * H])
    c_new = c * f + i * g
    h_new = jnp.tanh(c_new) * o
    logits = (jnp.dot(x, w_out_x, preferred_element_type=jnp.float32)
              + hmm(h_new, w_out_h) + b_out)
    return jax.nn.log_softmax(logits, axis=1), h_new, c_new


def _reference_seq(xs, h, c, params, use_bf16=False):
    outs = []
    for t in range(xs.shape[0]):
        out, h, c = _reference_step(xs[t], h, c, params, use_bf16=use_bf16)
        outs.append(out)
    return jnp.stack(outs), h, c


if __name__ == "__main__":
    B, T, D_IN, D_HID, D_OUT = 2, 8, 16, 32, 24

    key = jax.random.PRNGKey(0)
    ks = jax.random.split(key, 8)

    fan_in = D_IN + D_HID
    bound = 1.0 / np.sqrt(fan_in)

    # Gate weights: concat of [F, I, C, O] linears, pre-transposed to (in, out),
    # split into the input-part and hidden-part of the concatenated input.
    w_gate = jax.random.uniform(ks[0], (fan_in, 4 * D_HID), jnp.float32, -bound, bound)
    b_gate = jax.random.uniform(ks[1], (1, 4 * D_HID), jnp.float32, -bound, bound)
    w_out = jax.random.uniform(ks[2], (fan_in, D_OUT), jnp.float32, -bound, bound)
    b_out = jax.random.uniform(ks[3], (1, D_OUT), jnp.float32, -bound, bound)
    params = (w_gate[:D_IN], w_gate[D_IN:], b_gate,
              w_out[:D_IN], w_out[D_IN:], b_out)

    xs = jax.random.normal(ks[4], (T, B, D_IN), jnp.float32)
    h0 = jax.random.normal(ks[5], (B, D_HID), jnp.float32)
    c0 = jax.random.normal(ks[6], (B, D_HID), jnp.float32)

    # ---- f32 path (matches PyTorch module numerics), full sequence.
    out, h_f, c_f = lstm_layer_forward(xs, h0, c0, *params, use_bf16=False)
    jax.block_until_ready((out, h_f, c_f))
    ref_out, ref_h, ref_c = _reference_seq(xs, h0, c0, params, use_bf16=False)
    assert np.allclose(np.asarray(out), np.asarray(ref_out), atol=1e-4, rtol=1e-4)
    assert np.allclose(np.asarray(h_f), np.asarray(ref_h), atol=1e-4, rtol=1e-4)
    assert np.allclose(np.asarray(c_f), np.asarray(ref_c), atol=1e-4, rtol=1e-4)

    # ---- single-step API (module's forward signature).
    out1, (h1, c1) = lstm_layer_step(xs[0], h0, c0, params, use_bf16=False)
    jax.block_until_ready((out1, h1, c1))
    r_out1, r_h1, r_c1 = _reference_step(xs[0], h0, c0, params, use_bf16=False)
    assert np.allclose(np.asarray(out1), np.asarray(r_out1), atol=1e-4, rtol=1e-4)
    assert np.allclose(np.asarray(h1), np.asarray(r_h1), atol=1e-4, rtol=1e-4)
    assert np.allclose(np.asarray(c1), np.asarray(r_c1), atol=1e-4, rtol=1e-4)

    # ---- bf16-MXU-operand path (recommended on v6e/v7x), checked vs a
    #      reference that applies the same bf16 casts to the h-matmul operands.
    out_b, h_b, c_b = lstm_layer_forward(xs, h0, c0, *params, use_bf16=True)
    jax.block_until_ready((out_b, h_b, c_b))
    ref_out_b, ref_h_b, ref_c_b = _reference_seq(xs, h0, c0, params, use_bf16=True)
    assert np.allclose(np.asarray(out_b), np.asarray(ref_out_b), atol=2e-2, rtol=2e-2)
    assert np.allclose(np.asarray(h_b), np.asarray(ref_h_b), atol=2e-2, rtol=2e-2)
    assert np.allclose(np.asarray(c_b), np.asarray(ref_c_b), atol=2e-2, rtol=2e-2)

    print("KERNEL_OK")
</pallas_src>

<mosaic_0001>
module attributes {stable_mosaic.version = 11 : i64} {
  func.func @_head_kernel(%arg0: i32, %arg1: memref<16x128xf32, #tpu.memory_space<vmem>>, %arg2: memref<16x128xf32, #tpu.memory_space<vmem>>, %arg3: memref<128x128xf32, #tpu.memory_space<vmem>>, %arg4: memref<16x128xf32, #tpu.memory_space<vmem>>) attributes {dimension_semantics = [#tpu.dimension_semantics<parallel>], iteration_bounds = array<i64: 1>, scalar_prefetch = 0 : i64, scratch_operands = 0 : i64, tpu.core_type = #tpu.core_type<tc>, window_params = [{transform_indices = @transform_0, window_bounds = array<i64: 16, 128>}, {transform_indices = @transform_1, window_bounds = array<i64: 16, 128>}, {pipeline_mode = #tpu.pipeline_mode<synchronous>, transform_indices = @transform_2, window_bounds = array<i64: 128, 128>}, {transform_indices = @transform_3, window_bounds = array<i64: 16, 128>}]} {
    %c0 = arith.constant 0 : index
    %c0_0 = arith.constant 0 : index
    %0 = vector.load %arg2[%c0, %c0_0] : memref<16x128xf32, #tpu.memory_space<vmem>>, vector<16x128xf32>
    %c0_1 = arith.constant 0 : index
    %c0_2 = arith.constant 0 : index
    %1 = vector.load %arg1[%c0_1, %c0_2] : memref<16x128xf32, #tpu.memory_space<vmem>>, vector<16x128xf32>
    %c0_3 = arith.constant 0 : index
    %c0_4 = arith.constant 0 : index
    %2 = vector.load %arg3[%c0_3, %c0_4] : memref<128x128xf32, #tpu.memory_space<vmem>>, vector<128x128xf32>
    %cst = arith.constant dense<0.000000e+00> : vector<16x128xf32>
    %3 = tpu.matmul %1, %2, %cst {dimension_numbers = #tpu.dot_dimension_numbers<[1], [0], [0], [1], [0, 0, 1, 1], [], []>} : vector<16x128xf32>, vector<128x128xf32>, vector<16x128xf32> -> vector<16x128xf32>
    %4 = arith.addf %0, %3 : vector<16x128xf32>
    %cst_5 = arith.constant dense<0xFF800000> : vector<16xf32>
    %5 = vector.multi_reduction <maximumf>, %4, %cst_5 [1] : vector<16x128xf32> to vector<16xf32>
    %6 = vector.shape_cast %5 : vector<16xf32> to vector<16x1xf32>
    %7 = vector.broadcast %6 : vector<16x1xf32> to vector<16x128xf32>
    %8 = arith.subf %4, %7 : vector<16x128xf32>
    %9 = math.exp %8 : vector<16x128xf32>
    %cst_6 = arith.constant dense<0.000000e+00> : vector<16xf32>
    %10 = vector.multi_reduction <add>, %9, %cst_6 [1] : vector<16x128xf32> to vector<16xf32>
    %11 = vector.shape_cast %10 : vector<16xf32> to vector<16x1xf32>
    %12 = math.log %11 : vector<16x1xf32>
    %13 = arith.addf %6, %12 : vector<16x1xf32>
    %14 = vector.broadcast %13 : vector<16x1xf32> to vector<16x128xf32>
    %15 = arith.subf %4, %14 : vector<16x128xf32>
    %c0_7 = arith.constant 0 : index
    %c0_8 = arith.constant 0 : index
    %16 = vector.load %arg4[%c0_7, %c0_8] : memref<16x128xf32, #tpu.memory_space<vmem>>, vector<16x128xf32>
    tpu.vector_store %arg4[%c0_7, %c0_8], %15 {strides = array<i32>} : memref<16x128xf32, #tpu.memory_space<vmem>>, vector<16x128xf32>,
    return
  }
  func.func @transform_0(%arg0: i32) -> (i32, i32) {
    %c0_i32 = arith.constant 0 : i32
    %c0_i32_0 = arith.constant 0 : i32
    return %arg0, %c0_i32 : i32, i32
  }
  func.func @transform_1(%arg0: i32) -> (i32, i32) {
    %c0_i32 = arith.constant 0 : i32
    %c0_i32_0 = arith.constant 0 : i32
    return %arg0, %c0_i32 : i32, i32
  }
  func.func @transform_2(%arg0: i32) -> (i32, i32) {
    %c0_i32 = arith.constant 0 : i32
    %c0_i32_0 = arith.constant 0 : i32
    %c0_i32_1 = arith.constant 0 : i32
    return %c0_i32, %c0_i32_0 : i32, i32
  }
  func.func @transform_3(%arg0: i32) -> (i32, i32) {
    %c0_i32 = arith.constant 0 : i32
    %c0_i32_0 = arith.constant 0 : i32
    return %arg0, %c0_i32 : i32, i32
  }
}

module attributes {stable_mosaic.version = 11 : i64} {
  func.func @_lstm_recurrence_kernel(%arg0: i32, %arg1: memref<8x2x512xf32, #tpu.memory_space<vmem>>, %arg2: memref<2x128xf32, #tpu.memory_space<vmem>>, %arg3: memref<2x128xf32, #tpu.memory_space<vmem>>, %arg4: memref<128x512xf32, #tpu.memory_space<vmem>>, %arg5: memref<8x2x128xf32, #tpu.memory_space<vmem>>, %arg6: memref<2x128xf32, #tpu.memory_space<vmem>>, %arg7: memref<2x128xf32, #tpu.memory_space<vmem>>) attributes {dimension_semantics = [#tpu.dimension_semantics<arbitrary>], iteration_bounds = array<i64: 1>, scalar_prefetch = 0 : i64, scratch_operands = 0 : i64, tpu.core_type = #tpu.core_type<tc>, window_params = [{transform_indices = @transform_0, window_bounds = array<i64: 8, 2, 512>}, {pipeline_mode = #tpu.pipeline_mode<synchronous>, transform_indices = @transform_1, window_bounds = array<i64: 2, 128>}, {pipeline_mode = #tpu.pipeline_mode<synchronous>, transform_indices = @transform_2, window_bounds = array<i64: 2, 128>}, {pipeline_mode = #tpu.pipeline_mode<synchronous>, transform_indices = @transform_3, window_bounds = array<i64: 128, 512>}, {transform_indices = @transform_4, window_bounds = array<i64: 8, 2, 128>}, {pipeline_mode = #tpu.pipeline_mode<synchronous>, transform_indices = @transform_5, window_bounds = array<i64: 2, 128>}, {pipeline_mode = #tpu.pipeline_mode<synchronous>, transform_indices = @transform_6, window_bounds = array<i64: 2, 128>}]} {
    %c0_i32 = arith.constant 0 : i32
    %0 = arith.cmpi eq, %arg0, %c0_i32 : i32
    %1 = arith.extui %0 : i1 to i32
    %c0_i32_0 = arith.constant 0 : i32
    %2 = arith.cmpi ne, %1, %c0_i32_0 : i32
    scf.if %2 {
      %c0_74 = arith.constant 0 : index
      %c0_75 = arith.constant 0 : index
      %280 = vector.load %arg2[%c0_74, %c0_75] : memref<2x128xf32, #tpu.memory_space<vmem>>, vector<2x128xf32>
      %c0_76 = arith.constant 0 : index
      %c0_77 = arith.constant 0 : index
      %281 = vector.load %arg6[%c0_76, %c0_77] : memref<2x128xf32, #tpu.memory_space<vmem>>, vector<2x128xf32>
      tpu.vector_store %arg6[%c0_76, %c0_77], %280 {strides = array<i32>} : memref<2x128xf32, #tpu.memory_space<vmem>>, vector<2x128xf32>,
      %c0_78 = arith.constant 0 : index
      %c0_79 = arith.constant 0 : index
      %282 = vector.load %arg3[%c0_78, %c0_79] : memref<2x128xf32, #tpu.memory_space<vmem>>, vector<2x128xf32>
      %c0_80 = arith.constant 0 : index
      %c0_81 = arith.constant 0 : index
      %283 = vector.load %arg7[%c0_80, %c0_81] : memref<2x128xf32, #tpu.memory_space<vmem>>, vector<2x128xf32>
      tpu.vector_store %arg7[%c0_80, %c0_81], %282 {strides = array<i32>} : memref<2x128xf32, #tpu.memory_space<vmem>>, vector<2x128xf32>,
    } else {
    }
    %c0 = arith.constant 0 : index
    %c0_1 = arith.constant 0 : index
    %3 = vector.load %arg4[%c0, %c0_1] : memref<128x512xf32, #tpu.memory_space<vmem>>, vector<128x512xf32>
    %c0_2 = arith.constant 0 : index
    %c0_3 = arith.constant 0 : index
    %4 = vector.load %arg6[%c0_2, %c0_3] : memref<2x128xf32, #tpu.memory_space<vmem>>, vector<2x128xf32>
    %c0_4 = arith.constant 0 : index
    %c0_5 = arith.constant 0 : index
    %5 = vector.load %arg7[%c0_4, %c0_5] : memref<2x128xf32, #tpu.memory_space<vmem>>, vector<2x128xf32>
    %c0_i32_6 = arith.constant 0 : i32
    %6 = arith.index_cast %c0_i32_6 : i32 to index
    %c0_7 = arith.constant 0 : index
    %c0_8 = arith.constant 0 : index
    %7 = vector.load %arg1[%6, %c0_7, %c0_8] : memref<8x2x512xf32, #tpu.memory_space<vmem>>, vector<1x2x512xf32>
    %8 = vector.shape_cast %7 : vector<1x2x512xf32> to vector<2x512xf32>
    %cst = arith.constant dense<0.000000e+00> : vector<2x512xf32>
    %9 = tpu.matmul %4, %3, %cst {dimension_numbers = #tpu.dot_dimension_numbers<[1], [0], [0], [1], [0, 0, 1, 1], [], []>} : vector<2x128xf32>, vector<128x512xf32>, vector<2x512xf32> -> vector<2x512xf32>
    %10 = arith.addf %8, %9 : vector<2x512xf32>
    %11 = vector.extract_strided_slice %10 {offsets = [0, 0], sizes = [2, 128], strides = [1, 1]} : vector<2x512xf32> to vector<2x128xf32>
    %12 = arith.negf %11 : vector<2x128xf32>
    %13 = math.exp %12 : vector<2x128xf32>
    %cst_9 = arith.constant 1.000000e+00 : f32
    %14 = vector.broadcast %cst_9 : f32 to vector<2x128xf32>
    %15 = arith.addf %14, %13 : vector<2x128xf32>
    %16 = arith.divf %14, %15 : vector<2x128xf32>
    %17 = vector.extract_strided_slice %10 {offsets = [0, 128], sizes = [2, 128], strides = [1, 1]} : vector<2x512xf32> to vector<2x128xf32>
    %18 = arith.negf %17 : vector<2x128xf32>
    %19 = math.exp %18 : vector<2x128xf32>
    %cst_10 = arith.constant 1.000000e+00 : f32
    %20 = vector.broadcast %cst_10 : f32 to vector<2x128xf32>
    %21 = arith.addf %20, %19 : vector<2x128xf32>
    %22 = arith.divf %20, %21 : vector<2x128xf32>
    %23 = vector.extract_strided_slice %10 {offsets = [0, 256], sizes = [2, 128], strides = [1, 1]} : vector<2x512xf32> to vector<2x128xf32>
    %24 = math.tanh %23 : vector<2x128xf32>
    %25 = vector.extract_strided_slice %10 {offsets = [0, 384], sizes = [2, 128], strides = [1, 1]} : vector<2x512xf32> to vector<2x128xf32>
    %26 = arith.negf %25 : vector<2x128xf32>
    %27 = math.exp %26 : vector<2x128xf32>
    %cst_11 = arith.constant 1.000000e+00 : f32
    %28 = vector.broadcast %cst_11 : f32 to vector<2x128xf32>
    %29 = arith.addf %28, %27 : vector<2x128xf32>
    %30 = arith.divf %28, %29 : vector<2x128xf32>
    %31 = arith.mulf %5, %16 : vector<2x128xf32>
    %32 = arith.mulf %22, %24 : vector<2x128xf32>
    %33 = arith.addf %31, %32 : vector<2x128xf32>
    %34 = math.tanh %33 : vector<2x128xf32>
    %35 = arith.mulf %34, %30 : vector<2x128xf32>
    %36 = arith.index_cast %c0_i32_6 : i32 to index
    %c0_12 = arith.constant 0 : index
    %c0_13 = arith.constant 0 : index
    %37 = vector.load %arg5[%36, %c0_12, %c0_13] : memref<8x2x128xf32, #tpu.memory_space<vmem>>, vector<1x2x128xf32>
    %38 = vector.shape_cast %37 : vector<1x2x128xf32> to vector<2x128xf32>
    %39 = vector.shape_cast %35 : vector<2x128xf32> to vector<1x2x128xf32>
    tpu.vector_store %arg5[%36, %c0_12, %c0_13], %39 {strides = array<i32>} : memref<8x2x128xf32, #tpu.memory_space<vmem>>, vector<1x2x128xf32>,
    %c1_i32 = arith.constant 1 : i32
    %40 = arith.index_cast %c1_i32 : i32 to index
    %c0_14 = arith.constant 0 : index
    %c0_15 = arith.constant 0 : index
    %41 = vector.load %arg1[%40, %c0_14, %c0_15] : memref<8x2x512xf32, #tpu.memory_space<vmem>>, vector<1x2x512xf32>
    %42 = vector.shape_cast %41 : vector<1x2x512xf32> to vector<2x512xf32>
    %cst_16 = arith.constant dense<0.000000e+00> : vector<2x512xf32>
    %43 = tpu.matmul %35, %3, %cst_16 {dimension_numbers = #tpu.dot_dimension_numbers<[1], [0], [0], [1], [0, 0, 1, 1], [], []>} : vector<2x128xf32>, vector<128x512xf32>, vector<2x512xf32> -> vector<2x512xf32>
    %44 = arith.addf %42, %43 : vector<2x512xf32>
    %45 = vector.extract_strided_slice %44 {offsets = [0, 0], sizes = [2, 128], strides = [1, 1]} : vector<2x512xf32> to vector<2x128xf32>
    %46 = arith.negf %45 : vector<2x128xf32>
    %47 = math.exp %46 : vector<2x128xf32>
    %cst_17 = arith.constant 1.000000e+00 : f32
    %48 = vector.broadcast %cst_17 : f32 to vector<2x128xf32>
    %49 = arith.addf %48, %47 : vector<2x128xf32>
    %50 = arith.divf %48, %49 : vector<2x128xf32>
    %51 = vector.extract_strided_slice %44 {offsets = [0, 128], sizes = [2, 128], strides = [1, 1]} : vector<2x512xf32> to vector<2x128xf32>
    %52 = arith.negf %51 : vector<2x128xf32>
    %53 = math.exp %52 : vector<2x128xf32>
    %cst_18 = arith.constant 1.000000e+00 : f32
    %54 = vector.broadcast %cst_18 : f32 to vector<2x128xf32>
    %55 = arith.addf %54, %53 : vector<2x128xf32>
    %56 = arith.divf %54, %55 : vector<2x128xf32>
    %57 = vector.extract_strided_slice %44 {offsets = [0, 256], sizes = [2, 128], strides = [1, 1]} : vector<2x512xf32> to vector<2x128xf32>
    %58 = math.tanh %57 : vector<2x128xf32>
    %59 = vector.extract_strided_slice %44 {offsets = [0, 384], sizes = [2, 128], strides = [1, 1]} : vector<2x512xf32> to vector<2x128xf32>
    %60 = arith.negf %59 : vector<2x128xf32>
    %61 = math.exp %60 : vector<2x128xf32>
    %cst_19 = arith.constant 1.000000e+00 : f32
    %62 = vector.broadcast %cst_19 : f32 to vector<2x128xf32>
    %63 = arith.addf %62, %61 : vector<2x128xf32>
    %64 = arith.divf %62, %63 : vector<2x128xf32>
    %65 = arith.mulf %33, %50 : vector<2x128xf32>
    %66 = arith.mulf %56, %58 : vector<2x128xf32>
    %67 = arith.addf %65, %66 : vector<2x128xf32>
    %68 = math.tanh %67 : vector<2x128xf32>
    %69 = arith.mulf %68, %64 : vector<2x128xf32>
    %70 = arith.index_cast %c1_i32 : i32 to index
    %c0_20 = arith.constant 0 : index
    %c0_21 = arith.constant 0 : index
    %71 = vector.load %arg5[%70, %c0_20, %c0_21] : memref<8x2x128xf32, #tpu.memory_space<vmem>>, vector<1x2x128xf32>
    %72 = vector.shape_cast %71 : vector<1x2x128xf32> to vector<2x128xf32>
    %73 = vector.shape_cast %69 : vector<2x128xf32> to vector<1x2x128xf32>
    tpu.vector_store %arg5[%70, %c0_20, %c0_21], %73 {strides = array<i32>} : memref<8x2x128xf32, #tpu.memory_space<vmem>>, vector<1x2x128xf32>,
    %c2_i32 = arith.constant 2 : i32
    %74 = arith.index_cast %c2_i32 : i32 to index
    %c0_22 = arith.constant 0 : index
    %c0_23 = arith.constant 0 : index
    %75 = vector.load %arg1[%74, %c0_22, %c0_23] : memref<8x2x512xf32, #tpu.memory_space<vmem>>, vector<1x2x512xf32>
    %76 = vector.shape_cast %75 : vector<1x2x512xf32> to vector<2x512xf32>
    %cst_24 = arith.constant dense<0.000000e+00> : vector<2x512xf32>
    %77 = tpu.matmul %69, %3, %cst_24 {dimension_numbers = #tpu.dot_dimension_numbers<[1], [0], [0], [1], [0, 0, 1, 1], [], []>} : vector<2x128xf32>, vector<128x512xf32>, vector<2x512xf32> -> vector<2x512xf32>
    %78 = arith.addf %76, %77 : vector<2x512xf32>
    %79 = vector.extract_strided_slice %78 {offsets = [0, 0], sizes = [2, 128], strides = [1, 1]} : vector<2x512xf32> to vector<2x128xf32>
    %80 = arith.negf %79 : vector<2x128xf32>
    %81 = math.exp %80 : vector<2x128xf32>
    %cst_25 = arith.constant 1.000000e+00 : f32
    %82 = vector.broadcast %cst_25 : f32 to vector<2x128xf32>
    %83 = arith.addf %82, %81 : vector<2x128xf32>
    %84 = arith.divf %82, %83 : vector<2x128xf32>
    %85 = vector.extract_strided_slice %78 {offsets = [0, 128], sizes = [2, 128], strides = [1, 1]} : vector<2x512xf32> to vector<2x128xf32>
    %86 = arith.negf %85 : vector<2x128xf32>
    %87 = math.exp %86 : vector<2x128xf32>
    %cst_26 = arith.constant 1.000000e+00 : f32
    %88 = vector.broadcast %cst_26 : f32 to vector<2x128xf32>
    %89 = arith.addf %88, %87 : vector<2x128xf32>
    %90 = arith.divf %88, %89 : vector<2x128xf32>
    %91 = vector.extract_strided_slice %78 {offsets = [0, 256], sizes = [2, 128], strides = [1, 1]} : vector<2x512xf32> to vector<2x128xf32>
    %92 = math.tanh %91 : vector<2x128xf32>
    %93 = vector.extract_strided_slice %78 {offsets = [0, 384], sizes = [2, 128], strides = [1, 1]} : vector<2x512xf32> to vector<2x128xf32>
    %94 = arith.negf %93 : vector<2x128xf32>
    %95 = math.exp %94 : vector<2x128xf32>
    %cst_27 = arith.constant 1.000000e+00 : f32
    %96 = vector.broadcast %cst_27 : f32 to vector<2x128xf32>
    %97 = arith.addf %96, %95 : vector<2x128xf32>
    %98 = arith.divf %96, %97 : vector<2x128xf32>
    %99 = arith.mulf %67, %84 : vector<2x128xf32>
    %100 = arith.mulf %90, %92 : vector<2x128xf32>
    %101 = arith.addf %99, %100 : vector<2x128xf32>
    %102 = math.tanh %101 : vector<2x128xf32>
    %103 = arith.mulf %102, %98 : vector<2x128xf32>
    %104 = arith.index_cast %c2_i32 : i32 to index
    %c0_28 = arith.constant 0 : index
    %c0_29 = arith.constant 0 : index
    %105 = vector.load %arg5[%104, %c0_28, %c0_29] : memref<8x2x128xf32, #tpu.memory_space<vmem>>, vector<1x2x128xf32>
    %106 = vector.shape_cast %105 : vector<1x2x128xf32> to vector<2x128xf32>
    %107 = vector.shape_cast %103 : vector<2x128xf32> to vector<1x2x128xf32>
    tpu.vector_store %arg5[%104, %c0_28, %c0_29], %107 {strides = array<i32>} : memref<8x2x128xf32, #tpu.memory_space<vmem>>, vector<1x2x128xf32>,
    %c3_i32 = arith.constant 3 : i32
    %108 = arith.index_cast %c3_i32 : i32 to index
    %c0_30 = arith.constant 0 : index
    %c0_31 = arith.constant 0 : index
    %109 = vector.load %arg1[%108, %c0_30, %c0_31] : memref<8x2x512xf32, #tpu.memory_space<vmem>>, vector<1x2x512xf32>
    %110 = vector.shape_cast %109 : vector<1x2x512xf32> to vector<2x512xf32>
    %cst_32 = arith.constant dense<0.000000e+00> : vector<2x512xf32>
    %111 = tpu.matmul %103, %3, %cst_32 {dimension_numbers = #tpu.dot_dimension_numbers<[1], [0], [0], [1], [0, 0, 1, 1], [], []>} : vector<2x128xf32>, vector<128x512xf32>, vector<2x512xf32> -> vector<2x512xf32>
    %112 = arith.addf %110, %111 : vector<2x512xf32>
    %113 = vector.extract_strided_slice %112 {offsets = [0, 0], sizes = [2, 128], strides = [1, 1]} : vector<2x512xf32> to vector<2x128xf32>
    %114 = arith.negf %113 : vector<2x128xf32>
    %115 = math.exp %114 : vector<2x128xf32>
    %cst_33 = arith.constant 1.000000e+00 : f32
    %116 = vector.broadcast %cst_33 : f32 to vector<2x128xf32>
    %117 = arith.addf %116, %115 : vector<2x128xf32>
    %118 = arith.divf %116, %117 : vector<2x128xf32>
    %119 = vector.extract_strided_slice %112 {offsets = [0, 128], sizes = [2, 128], strides = [1, 1]} : vector<2x512xf32> to vector<2x128xf32>
    %120 = arith.negf %119 : vector<2x128xf32>
    %121 = math.exp %120 : vector<2x128xf32>
    %cst_34 = arith.constant 1.000000e+00 : f32
    %122 = vector.broadcast %cst_34 : f32 to vector<2x128xf32>
    %123 = arith.addf %122, %121 : vector<2x128xf32>
    %124 = arith.divf %122, %123 : vector<2x128xf32>
    %125 = vector.extract_strided_slice %112 {offsets = [0, 256], sizes = [2, 128], strides = [1, 1]} : vector<2x512xf32> to vector<2x128xf32>
    %126 = math.tanh %125 : vector<2x128xf32>
    %127 = vector.extract_strided_slice %112 {offsets = [0, 384], sizes = [2, 128], strides = [1, 1]} : vector<2x512xf32> to vector<2x128xf32>
    %128 = arith.negf %127 : vector<2x128xf32>
    %129 = math.exp %128 : vector<2x128xf32>
    %cst_35 = arith.constant 1.000000e+00 : f32
    %130 = vector.broadcast %cst_35 : f32 to vector<2x128xf32>
    %131 = arith.addf %130, %129 : vector<2x128xf32>
    %132 = arith.divf %130, %131 : vector<2x128xf32>
    %133 = arith.mulf %101, %118 : vector<2x128xf32>
    %134 = arith.mulf %124, %126 : vector<2x128xf32>
    %135 = arith.addf %133, %134 : vector<2x128xf32>
    %136 = math.tanh %135 : vector<2x128xf32>
    %137 = arith.mulf %136, %132 : vector<2x128xf32>
    %138 = arith.index_cast %c3_i32 : i32 to index
    %c0_36 = arith.constant 0 : index
    %c0_37 = arith.constant 0 : index
    %139 = vector.load %arg5[%138, %c0_36, %c0_37] : memref<8x2x128xf32, #tpu.memory_space<vmem>>, vector<1x2x128xf32>
    %140 = vector.shape_cast %139 : vector<1x2x128xf32> to vector<2x128xf32>
    %141 = vector.shape_cast %137 : vector<2x128xf32> to vector<1x2x128xf32>
    tpu.vector_store %arg5[%138, %c0_36, %c0_37], %141 {strides = array<i32>} : memref<8x2x128xf32, #tpu.memory_space<vmem>>, vector<1x2x128xf32>,
    %c4_i32 = arith.constant 4 : i32
    %142 = arith.index_cast %c4_i32 : i32 to index
    %c0_38 = arith.constant 0 : index
    %c0_39 = arith.constant 0 : index
    %143 = vector.load %arg1[%142, %c0_38, %c0_39] : memref<8x2x512xf32, #tpu.memory_space<vmem>>, vector<1x2x512xf32>
    %144 = vector.shape_cast %143 : vector<1x2x512xf32> to vector<2x512xf32>
    %cst_40 = arith.constant dense<0.000000e+00> : vector<2x512xf32>
    %145 = tpu.matmul %137, %3, %cst_40 {dimension_numbers = #tpu.dot_dimension_numbers<[1], [0], [0], [1], [0, 0, 1, 1], [], []>} : vector<2x128xf32>, vector<128x512xf32>, vector<2x512xf32> -> vector<2x512xf32>
    %146 = arith.addf %144, %145 : vector<2x512xf32>
    %147 = vector.extract_strided_slice %146 {offsets = [0, 0], sizes = [2, 128], strides = [1, 1]} : vector<2x512xf32> to vector<2x128xf32>
    %148 = arith.negf %147 : vector<2x128xf32>
    %149 = math.exp %148 : vector<2x128xf32>
    %cst_41 = arith.constant 1.000000e+00 : f32
    %150 = vector.broadcast %cst_41 : f32 to vector<2x128xf32>
    %151 = arith.addf %150, %149 : vector<2x128xf32>
    %152 = arith.divf %150, %151 : vector<2x128xf32>
    %153 = vector.extract_strided_slice %146 {offsets = [0, 128], sizes = [2, 128], strides = [1, 1]} : vector<2x512xf32> to vector<2x128xf32>
    %154 = arith.negf %153 : vector<2x128xf32>
    %155 = math.exp %154 : vector<2x128xf32>
    %cst_42 = arith.constant 1.000000e+00 : f32
    %156 = vector.broadcast %cst_42 : f32 to vector<2x128xf32>
    %157 = arith.addf %156, %155 : vector<2x128xf32>
    %158 = arith.divf %156, %157 : vector<2x128xf32>
    %159 = vector.extract_strided_slice %146 {offsets = [0, 256], sizes = [2, 128], strides = [1, 1]} : vector<2x512xf32> to vector<2x128xf32>
    %160 = math.tanh %159 : vector<2x128xf32>
    %161 = vector.extract_strided_slice %146 {offsets = [0, 384], sizes = [2, 128], strides = [1, 1]} : vector<2x512xf32> to vector<2x128xf32>
    %162 = arith.negf %161 : vector<2x128xf32>
    %163 = math.exp %162 : vector<2x128xf32>
    %cst_43 = arith.constant 1.000000e+00 : f32
    %164 = vector.broadcast %cst_43 : f32 to vector<2x128xf32>
    %165 = arith.addf %164, %163 : vector<2x128xf32>
    %166 = arith.divf %164, %165 : vector<2x128xf32>
    %167 = arith.mulf %135, %152 : vector<2x128xf32>
    %168 = arith.mulf %158, %160 : vector<2x128xf32>
    %169 = arith.addf %167, %168 : vector<2x128xf32>
    %170 = math.tanh %169 : vector<2x128xf32>
    %171 = arith.mulf %170, %166 : vector<2x128xf32>
    %172 = arith.index_cast %c4_i32 : i32 to index
    %c0_44 = arith.constant 0 : index
    %c0_45 = arith.constant 0 : index
    %173 = vector.load %arg5[%172, %c0_44, %c0_45] : memref<8x2x128xf32, #tpu.memory_space<vmem>>, vector<1x2x128xf32>
    %174 = vector.shape_cast %173 : vector<1x2x128xf32> to vector<2x128xf32>
    %175 = vector.shape_cast %171 : vector<2x128xf32> to vector<1x2x128xf32>
    tpu.vector_store %arg5[%172, %c0_44, %c0_45], %175 {strides = array<i32>} : memref<8x2x128xf32, #tpu.memory_space<vmem>>, vector<1x2x128xf32>,
    %c5_i32 = arith.constant 5 : i32
    %176 = arith.index_cast %c5_i32 : i32 to index
    %c0_46 = arith.constant 0 : index
    %c0_47 = arith.constant 0 : index
    %177 = vector.load %arg1[%176, %c0_46, %c0_47] : memref<8x2x512xf32, #tpu.memory_space<vmem>>, vector<1x2x512xf32>
    %178 = vector.shape_cast %177 : vector<1x2x512xf32> to vector<2x512xf32>
    %cst_48 = arith.constant dense<0.000000e+00> : vector<2x512xf32>
    %179 = tpu.matmul %171, %3, %cst_48 {dimension_numbers = #tpu.dot_dimension_numbers<[1], [0], [0], [1], [0, 0, 1, 1], [], []>} : vector<2x128xf32>, vector<128x512xf32>, vector<2x512xf32> -> vector<2x512xf32>
    %180 = arith.addf %178, %179 : vector<2x512xf32>
    %181 = vector.extract_strided_slice %180 {offsets = [0, 0], sizes = [2, 128], strides = [1, 1]} : vector<2x512xf32> to vector<2x128xf32>
    %182 = arith.negf %181 : vector<2x128xf32>
    %183 = math.exp %182 : vector<2x128xf32>
    %cst_49 = arith.constant 1.000000e+00 : f32
    %184 = vector.broadcast %cst_49 : f32 to vector<2x128xf32>
    %185 = arith.addf %184, %183 : vector<2x128xf32>
    %186 = arith.divf %184, %185 : vector<2x128xf32>
    %187 = vector.extract_strided_slice %180 {offsets = [0, 128], sizes = [2, 128], strides = [1, 1]} : vector<2x512xf32> to vector<2x128xf32>
    %188 = arith.negf %187 : vector<2x128xf32>
    %189 = math.exp %188 : vector<2x128xf32>
    %cst_50 = arith.constant 1.000000e+00 : f32
    %190 = vector.broadcast %cst_50 : f32 to vector<2x128xf32>
    %191 = arith.addf %190, %189 : vector<2x128xf32>
    %192 = arith.divf %190, %191 : vector<2x128xf32>
    %193 = vector.extract_strided_slice %180 {offsets = [0, 256], sizes = [2, 128], strides = [1, 1]} : vector<2x512xf32> to vector<2x128xf32>
    %194 = math.tanh %193 : vector<2x128xf32>
    %195 = vector.extract_strided_slice %180 {offsets = [0, 384], sizes = [2, 128], strides = [1, 1]} : vector<2x512xf32> to vector<2x128xf32>
    %196 = arith.negf %195 : vector<2x128xf32>
    %197 = math.exp %196 : vector<2x128xf32>
    %cst_51 = arith.constant 1.000000e+00 : f32
    %198 = vector.broadcast %cst_51 : f32 to vector<2x128xf32>
    %199 = arith.addf %198, %197 : vector<2x128xf32>
    %200 = arith.divf %198, %199 : vector<2x128xf32>
    %201 = arith.mulf %169, %186 : vector<2x128xf32>
    %202 = arith.mulf %192, %194 : vector<2x128xf32>
    %203 = arith.addf %201, %202 : vector<2x128xf32>
    %204 = math.tanh %203 : vector<2x128xf32>
    %205 = arith.mulf %204, %200 : vector<2x128xf32>
    %206 = arith.index_cast %c5_i32 : i32 to index
    %c0_52 = arith.constant 0 : index
    %c0_53 = arith.constant 0 : index
    %207 = vector.load %arg5[%206, %c0_52, %c0_53] : memref<8x2x128xf32, #tpu.memory_space<vmem>>, vector<1x2x128xf32>
    %208 = vector.shape_cast %207 : vector<1x2x128xf32> to vector<2x128xf32>
    %209 = vector.shape_cast %205 : vector<2x128xf32> to vector<1x2x128xf32>
    tpu.vector_store %arg5[%206, %c0_52, %c0_53], %209 {strides = array<i32>} : memref<8x2x128xf32, #tpu.memory_space<vmem>>, vector<1x2x128xf32>,
    %c6_i32 = arith.constant 6 : i32
    %210 = arith.index_cast %c6_i32 : i32 to index
    %c0_54 = arith.constant 0 : index
    %c0_55 = arith.constant 0 : index
    %211 = vector.load %arg1[%210, %c0_54, %c0_55] : memref<8x2x512xf32, #tpu.memory_space<vmem>>, vector<1x2x512xf32>
    %212 = vector.shape_cast %211 : vector<1x2x512xf32> to vector<2x512xf32>
    %cst_56 = arith.constant dense<0.000000e+00> : vector<2x512xf32>
    %213 = tpu.matmul %205, %3, %cst_56 {dimension_numbers = #tpu.dot_dimension_numbers<[1], [0], [0], [1], [0, 0, 1, 1], [], []>} : vector<2x128xf32>, vector<128x512xf32>, vector<2x512xf32> -> vector<2x512xf32>
    %214 = arith.addf %212, %213 : vector<2x512xf32>
    %215 = vector.extract_strided_slice %214 {offsets = [0, 0], sizes = [2, 128], strides = [1, 1]} : vector<2x512xf32> to vector<2x128xf32>
    %216 = arith.negf %215 : vector<2x128xf32>
    %217 = math.exp %216 : vector<2x128xf32>
    %cst_57 = arith.constant 1.000000e+00 : f32
    %218 = vector.broadcast %cst_57 : f32 to vector<2x128xf32>
    %219 = arith.addf %218, %217 : vector<2x128xf32>
    %220 = arith.divf %218, %219 : vector<2x128xf32>
    %221 = vector.extract_strided_slice %214 {offsets = [0, 128], sizes = [2, 128], strides = [1, 1]} : vector<2x512xf32> to vector<2x128xf32>
    %222 = arith.negf %221 : vector<2x128xf32>
    %223 = math.exp %222 : vector<2x128xf32>
    %cst_58 = arith.constant 1.000000e+00 : f32
    %224 = vector.broadcast %cst_58 : f32 to vector<2x128xf32>
    %225 = arith.addf %224, %223 : vector<2x128xf32>
    %226 = arith.divf %224, %225 : vector<2x128xf32>
    %227 = vector.extract_strided_slice %214 {offsets = [0, 256], sizes = [2, 128], strides = [1, 1]} : vector<2x512xf32> to vector<2x128xf32>
    %228 = math.tanh %227 : vector<2x128xf32>
    %229 = vector.extract_strided_slice %214 {offsets = [0, 384], sizes = [2, 128], strides = [1, 1]} : vector<2x512xf32> to vector<2x128xf32>
    %230 = arith.negf %229 : vector<2x128xf32>
    %231 = math.exp %230 : vector<2x128xf32>
    %cst_59 = arith.constant 1.000000e+00 : f32
    %232 = vector.broadcast %cst_59 : f32 to vector<2x128xf32>
    %233 = arith.addf %232, %231 : vector<2x128xf32>
    %234 = arith.divf %232, %233 : vector<2x128xf32>
    %235 = arith.mulf %203, %220 : vector<2x128xf32>
    %236 = arith.mulf %226, %228 : vector<2x128xf32>
    %237 = arith.addf %235, %236 : vector<2x128xf32>
    %238 = math.tanh %237 : vector<2x128xf32>
    %239 = arith.mulf %238, %234 : vector<2x128xf32>
    %240 = arith.index_cast %c6_i32 : i32 to index
    %c0_60 = arith.constant 0 : index
    %c0_61 = arith.constant 0 : index
    %241 = vector.load %arg5[%240, %c0_60, %c0_61] : memref<8x2x128xf32, #tpu.memory_space<vmem>>, vector<1x2x128xf32>
    %242 = vector.shape_cast %241 : vector<1x2x128xf32> to vector<2x128xf32>
    %243 = vector.shape_cast %239 : vector<2x128xf32> to vector<1x2x128xf32>
    tpu.vector_store %arg5[%240, %c0_60, %c0_61], %243 {strides = array<i32>} : memref<8x2x128xf32, #tpu.memory_space<vmem>>, vector<1x2x128xf32>,
    %c7_i32 = arith.constant 7 : i32
    %244 = arith.index_cast %c7_i32 : i32 to index
    %c0_62 = arith.constant 0 : index
    %c0_63 = arith.constant 0 : index
    %245 = vector.load %arg1[%244, %c0_62, %c0_63] : memref<8x2x512xf32, #tpu.memory_space<vmem>>, vector<1x2x512xf32>
    %246 = vector.shape_cast %245 : vector<1x2x512xf32> to vector<2x512xf32>
    %cst_64 = arith.constant dense<0.000000e+00> : vector<2x512xf32>
    %247 = tpu.matmul %239, %3, %cst_64 {dimension_numbers = #tpu.dot_dimension_numbers<[1], [0], [0], [1], [0, 0, 1, 1], [], []>} : vector<2x128xf32>, vector<128x512xf32>, vector<2x512xf32> -> vector<2x512xf32>
    %248 = arith.addf %246, %247 : vector<2x512xf32>
    %249 = vector.extract_strided_slice %248 {offsets = [0, 0], sizes = [2, 128], strides = [1, 1]} : vector<2x512xf32> to vector<2x128xf32>
    %250 = arith.negf %249 : vector<2x128xf32>
    %251 = math.exp %250 : vector<2x128xf32>
    %cst_65 = arith.constant 1.000000e+00 : f32
    %252 = vector.broadcast %cst_65 : f32 to vector<2x128xf32>
    %253 = arith.addf %252, %251 : vector<2x128xf32>
    %254 = arith.divf %252, %253 : vector<2x128xf32>
    %255 = vector.extract_strided_slice %248 {offsets = [0, 128], sizes = [2, 128], strides = [1, 1]} : vector<2x512xf32> to vector<2x128xf32>
    %256 = arith.negf %255 : vector<2x128xf32>
    %257 = math.exp %256 : vector<2x128xf32>
    %cst_66 = arith.constant 1.000000e+00 : f32
    %258 = vector.broadcast %cst_66 : f32 to vector<2x128xf32>
    %259 = arith.addf %258, %257 : vector<2x128xf32>
    %260 = arith.divf %258, %259 : vector<2x128xf32>
    %261 = vector.extract_strided_slice %248 {offsets = [0, 256], sizes = [2, 128], strides = [1, 1]} : vector<2x512xf32> to vector<2x128xf32>
    %262 = math.tanh %261 : vector<2x128xf32>
    %263 = vector.extract_strided_slice %248 {offsets = [0, 384], sizes = [2, 128], strides = [1, 1]} : vector<2x512xf32> to vector<2x128xf32>
    %264 = arith.negf %263 : vector<2x128xf32>
    %265 = math.exp %264 : vector<2x128xf32>
    %cst_67 = arith.constant 1.000000e+00 : f32
    %266 = vector.broadcast %cst_67 : f32 to vector<2x128xf32>
    %267 = arith.addf %266, %265 : vector<2x128xf32>
    %268 = arith.divf %266, %267 : vector<2x128xf32>
    %269 = arith.mulf %237, %254 : vector<2x128xf32>
    %270 = arith.mulf %260, %262 : vector<2x128xf32>
    %271 = arith.addf %269, %270 : vector<2x128xf32>
    %272 = math.tanh %271 : vector<2x128xf32>
    %273 = arith.mulf %272, %268 : vector<2x128xf32>
    %274 = arith.index_cast %c7_i32 : i32 to index
    %c0_68 = arith.constant 0 : index
    %c0_69 = arith.constant 0 : index
    %275 = vector.load %arg5[%274, %c0_68, %c0_69] : memref<8x2x128xf32, #tpu.memory_space<vmem>>, vector<1x2x128xf32>
    %276 = vector.shape_cast %275 : vector<1x2x128xf32> to vector<2x128xf32>
    %277 = vector.shape_cast %273 : vector<2x128xf32> to vector<1x2x128xf32>
    tpu.vector_store %arg5[%274, %c0_68, %c0_69], %277 {strides = array<i32>} : memref<8x2x128xf32, #tpu.memory_space<vmem>>, vector<1x2x128xf32>,
    %c8_i32 = arith.constant 8 : i32
    %c0_70 = arith.constant 0 : index
    %c0_71 = arith.constant 0 : index
    %278 = vector.load %arg6[%c0_70, %c0_71] : memref<2x128xf32, #tpu.memory_space<vmem>>, vector<2x128xf32>
    tpu.vector_store %arg6[%c0_70, %c0_71], %273 {strides = array<i32>} : memref<2x128xf32, #tpu.memory_space<vmem>>, vector<2x128xf32>,
    %c0_72 = arith.constant 0 : index
    %c0_73 = arith.constant 0 : index
    %279 = vector.load %arg7[%c0_72, %c0_73] : memref<2x128xf32, #tpu.memory_space<vmem>>, vector<2x128xf32>
    tpu.vector_store %arg7[%c0_72, %c0_73], %271 {strides = array<i32>} : memref<2x128xf32, #tpu.memory_space<vmem>>, vector<2x128xf32>,
    return
  }
  func.func @transform_0(%arg0: i32) -> (i32, i32, i32) {
    %c0_i32 = arith.constant 0 : i32
    %c0_i32_0 = arith.constant 0 : i32
    %c0_i32_1 = arith.constant 0 : i32
    return %arg0, %c0_i32, %c0_i32_0 : i32, i32, i32
  }
  func.func @transform_1(%arg0: i32) -> (i32, i32) {
    %c0_i32 = arith.constant 0 : i32
    %c0_i32_0 = arith.constant 0 : i32
    %c0_i32_1 = arith.constant 0 : i32
    return %c0_i32, %c0_i32_0 : i32, i32
  }
  func.func @transform_2(%arg0: i32) -> (i32, i32) {
    %c0_i32 = arith.constant 0 : i32
    %c0_i32_0 = arith.constant 0 : i32
    %c0_i32_1 = arith.constant 0 : i32
    return %c0_i32, %c0_i32_0 : i32, i32
  }
  func.func @transform_3(%arg0: i32) -> (i32, i32) {
    %c0_i32 = arith.constant 0 : i32
    %c0_i32_0 = arith.constant 0 : i32
    %c0_i32_1 = arith.constant 0 : i32
    return %c0_i32, %c0_i32_0 : i32, i32
  }
  func.func @transform_4(%arg0: i32) -> (i32, i32, i32) {
    %c0_i32 = arith.constant 0 : i32
    %c0_i32_0 = arith.constant 0 : i32
    %c0_i32_1 = arith.constant 0 : i32
    return %arg0, %c0_i32, %c0_i32_0 : i32, i32, i32
  }
  func.func @transform_5(%arg0: i32) -> (i32, i32) {
    %c0_i32 = arith.constant 0 : i32
    %c0_i32_0 = arith.constant 0 : i32
    %c0_i32_1 = arith.constant 0 : i32
    return %c0_i32, %c0_i32_0 : i32, i32
  }
  func.func @transform_6(%arg0: i32) -> (i32, i32) {
    %c0_i32 = arith.constant 0 : i32
    %c0_i32_0 = arith.constant 0 : i32
    %c0_i32_1 = arith.constant 0 : i32
    return %c0_i32, %c0_i32_0 : i32, i32
  }
}

</mosaic_0001>

<bundles_post_ra>
// kernel: lstm_layer_forward.3
= control target key start
LH: loop header
LB: loop body
LE: loop exit
PB: predicated region body
PF: predicated region fallthrough
CT: control target
= control target key end

     0   :  { %s367_s0 = inlined_call_operand.vmem [shape: f32[16,128], index: 0, kind: input, shape index: {}]   ;;  %s368_s1 = inlined_call_operand.vmem [shape: f32[16,128], index: 1, kind: input, shape index: {}]   ;;  %s369_s2 = inlined_call_operand.vmem [shape: f32[128,128], index: 2, kind: input, shape index: {}]   ;;  %s370_s3 = inlined_call_operand.hbm [shape: f32[16,128], index: 3, kind: output, shape index: {}]  }
   0x1   :  { %v19_v0 = vld [vmem:[%s369_s2] sm:$0xff]  ;;  %v20_v1 = vld [vmem:[%s369_s2 + $0x8] sm:$0xff]  ;;  %v21_v2 = vld [vmem:[%s369_s2 + $0x10] sm:$0xff] }
   0x2   :  { %v205_v3 = vpack.c.bf16 %v20_v1, %v19_v0  ;;  %v22_v4 = vld [vmem:[%s369_s2 + $0x18] sm:$0xff]  ;;  %v23_v6 = vld [vmem:[%s369_s2 + $0x20] sm:$0xff]  ;;  %v24_v7 = vld [vmem:[%s369_s2 + $0x28] sm:$0xff] }
   0x3   :  { %v209_v5 = vpack.c.bf16 %v22_v4, %v21_v2  ;;  %v213_v8 = vpack.c.bf16 %v24_v7, %v23_v6  ;;  %v17_v9 = vld [vmem:[%s367_s0] sm:$0xff]  ;;  %v25_v10 = vld [vmem:[%s369_s2 + $0x30] sm:$0xff]  ;;  %v26_v11 = vld [vmem:[%s369_s2 + $0x38] sm:$0xff] }
   0x4   :  { %206 = vmatprep.subr.bf16.mxu0 %v205_v3  ;;  %202 = vmatprep.mubr.f32.mxu0 %v17_v9 }
   0x5   :  { %208 = vmatpush3.bf16.msra.mxu0 %v205_v3 }
   0x6   :  { %210 = vmatprep.subr.bf16.mxu0 %v209_v5 }
   0x7   :  { %8 = vsyncpa [#allocation3], 0  ;;  %v217_v12 = vpack.c.bf16 %v26_v11, %v25_v10  ;;  %v27_v13 = vld [vmem:[%s369_s2 + $0x40] sm:$0xff]  ;;  %v28_v14 = vld [vmem:[%s369_s2 + $0x48] sm:$0xff] }
   0x8   :  { %v221_v15 = vpack.c.bf16 %v28_v14, %v27_v13  ;;  %v29_v16 = vld [vmem:[%s369_s2 + $0x50] sm:$0xff]  ;;  %v30_v17 = vld [vmem:[%s369_s2 + $0x58] sm:$0xff]  ;;  %v31_v19 = vld [vmem:[%s369_s2 + $0x60] sm:$0xff] }
   0x9   :  { %212 = vmatpush3.bf16.msra.mxu0 %v209_v5  ;;  %v225_v18 = vpack.c.bf16 %v30_v17, %v29_v16  ;;  %v32_v20 = vld [vmem:[%s369_s2 + $0x68] sm:$0xff]  ;;  %v33_v22 = vld [vmem:[%s369_s2 + $0x70] sm:$0xff]  ;;  %v34_v23 = vld [vmem:[%s369_s2 + $0x78] sm:$0xff] }
   0xa   :  { %214 = vmatprep.subr.bf16.mxu0 %v213_v8  ;;  %v229_v21 = vpack.c.bf16 %v32_v20, %v31_v19  ;;  %v233_v24 = vpack.c.bf16 %v34_v23, %v33_v22  ;;  %v18_v25 = vld [vmem:[%s367_s0 + $0x8] sm:$0xff]  ;;  %v15_v26 = vld [vmem:[%s368_s1] sm:$0xff]  ;;  %s272_s0 = smov [#allocation2]  }
   0xb   :  { %v16_v30 = vld [vmem:[%s368_s1 + $0x8] sm:$0xff]  ;;  %s141_s1 = sshll.u32 %s272_s0, 4  ;;  %s142_s1 = int_to_ptr.vmem [resolvable:$true] %s141_s1 }
   0xc   :  { %s248_s24 = scalar_lea.vmem %s142_s1, 256  ;;  %p253_p1 = scmp.lt.s32.totalorder %s142_s1, %s142_s1 }
   0xd   :  { %216 = vmatpush3.bf16.msra.mxu0 %v213_v8  ;;  %p249_p0 = scmp.ne.s32.totalorder %s142_s1, %s248_s24  ;;  %p254_p2 = scmp.lt.s32.totalorder %s248_s24, %s248_s24 }
   0xe   :  { %218 = vmatprep.subr.bf16.mxu0 %v217_v12 }
   0xf   :  { %p255_p3 = por %p254_p2, %p253_p1 }
  0x11   :  { %220 = vmatpush3.bf16.msra.mxu0 %v217_v12  ;;  %p256_p4 = pnand %p255_p3, %p249_p0 }
  0x12   :  { %222 = vmatprep.subr.bf16.mxu0 %v221_v15 }
  0x15   :  { %224 = vmatpush3.bf16.msra.mxu0 %v221_v15 }
  0x16   :  { %226 = vmatprep.subr.bf16.mxu0 %v225_v18 }
  0x19   :  { %228 = vmatpush3.bf16.msra.mxu0 %v225_v18 }
  0x1a   :  { %230 = vmatprep.subr.bf16.mxu0 %v229_v21 }
  0x1d   :  { %232 = vmatpush3.bf16.msra.mxu0 %v229_v21 }
  0x1e   :  { %234 = vmatprep.subr.bf16.mxu0 %v233_v24 }
  0x21   :  { %236 = vmatpush3.bf16.msra.mxu0 %v233_v24 }
  0x24   :  { %203 = vmatmul.mubr.f32.vlgmr.msra.gmra.mrb[0].mxu0 %v18_v25 }
  0xf7   :  { %v204_v27 = vpop.f32.mrb[0].mxu0 }
  0xf8   :  { %v101_v28 = vpop.f32.mrb[1].mxu0  ;;  %v111_v31 = vadd.f32 %v204_v27, %v16_v30 }
  0xf9   :  { %v110_v29 = vadd.f32 %v101_v28, %v15_v26 }
  0xfb   :  { %112 = vmax.xlane.f32.xlu0 %v110_v29 }
  0xff   :  { %114 = vmax.xlane.f32.xlu0 %v111_v31 }
 0x188   :  { %v113_v32 = vpop.xlane.xlu0 %112 }
 0x189   :  { %v116_v33 = vsub.f32 %v110_v29, %v113_v32 }
 0x18b   :  { %v118_v34 = vmul.f32 1.442695, %v116_v33 }
 0x18c   :  { %v115_v35 = vpop.xlane.xlu0 %114 }
 0x18d   :  { %v117_v36 = vsub.f32 %v111_v31, %v115_v35  ;;  %240 = vpow2.f32 %v118_v34 }
 0x18f   :  { %v120_v37 = vmul.f32 1.442695, %v117_v36 }
 0x191   :  { %242 = vpow2.f32 %v120_v37 }
 0x197   :  { %v241_v38 = vpop.eup %240 }
 0x198   :  { %122 = vadd.xlane.f32.xlu1 %v241_v38 }
 0x19b   :  { %v243_v39 = vpop.eup %242 }
 0x19c   :  { %124 = vadd.xlane.f32.xlu1 %v243_v39 }
 0x225   :  { %v123_v40 = vpop.xlane.xlu1 %122 }
 0x226   :  { %244 = vlog2.f32 %v123_v40 }
 0x229   :  { %v125_v41 = vpop.xlane.xlu1 %124 }
 0x22a   :  { %246 = vlog2.f32 %v125_v41 }
 0x230   :  { %v245_v42 = vpop.eup %244 }
 0x231   :  { %v127_v43 = vmul.f32 0.6931472, %v245_v42 }
 0x233   :  { %v130_v44 = vadd.f32 %v127_v43, %v113_v32 }
 0x234   :  { %v247_v45 = vpop.eup %246 }
 0x235   :  { %v132_v46 = vsub.f32 %v110_v29, %v130_v44  ;;  %v129_v47 = vmul.f32 0.6931472, %v247_v45 }
 0x237   :  { %134 = vst [vmem:[#allocation2] sm:$0xff] %v132_v46  ;;  %v131_v48 = vadd.f32 %v129_v47, %v115_v35 }
 0x239   :  { %v133_v49 = vsub.f32 %v111_v31, %v131_v48 }
 0x23b   :  { %135 = vst [vmem:[#allocation2 + $0x8] sm:$0xff] %v133_v49 }
 0x23c   :  { %259 = shalt.err (!%p256_p4)
}
 0x23d   :  { %s260_s27 = scalar_lea.hbm %s370_s3, 256 }
 0x23e   :  { %p261_p5 = scmp.ne.s32.totalorder %s370_s3, %s260_s27  ;;  %p264_p6 = scmp.lt.u32.totalorder %s260_s27, %s370_s3 }
 0x240   :  { %p266_p7 = pnand %p264_p6, %p261_p5 }
 0x242   :  { %269 = shalt.err (!%p266_p7)
}
 0x243   :  { %s273_s5 = smov 128   ;;  %s274_s6 = smov 8  }
 0x244   :  { %147 = dma.vmem_to_hbm [thread:$0]  %s142_s1, 256, %s370_s3, [#allocation3], %s273_s5, %s273_s5, %s274_s6  }
 0x245   :  { %270 = dma.done.wait [#allocation3], 256  }
 0x246   :  { %271 = vsyncadd [#allocation3], 4294967040 }
 0x247   :  { %151 = vsyncpa [#allocation3], 1 }

// kernel: lstm_layer_forward.2
= control target key start
LH: loop header
LB: loop body
LE: loop exit
PB: predicated region body
PF: predicated region fallthrough
CT: control target
= control target key end

     0   :  { %12 = vsyncpa [#allocation3], 0  ;;  %v2458_v7 = vmov 0.0   ;;  %s3145_s0 = inlined_call_operand.vmem [shape: f32[8,2,512], index: 0, kind: input, shape index: {}]   ;;  %s3146_s1 = inlined_call_operand.vmem [shape: f32[2,128], index: 1, kind: input, shape index: {}]   ;;  %s3147_s2 = inlined_call_operand.vmem [shape: f32[2,128], index: 2, kind: input, shape index: {}]   ;;  %s3148_s3 = inlined_call_operand.vmem [shape: f32[128,512], index: 3, kind: input, shape index: {}]   ;;  %s3149_s4 = inlined_call_operand.vmem [shape: f32[8,2,128], index: 4, kind: output, shape index: {0}]   ;;  %s3150_s5 = inlined_call_operand.hbm [shape: f32[2,128], index: 5, kind: output, shape index: {1}]   ;;  %s3151_s6 = inlined_call_operand.hbm [shape: f32[2,128], index: 6, kind: output, shape index: {2}]  }
   0x1   :  { %v31_v0 = vld [vmem:[%s3148_s3 + $0x8] sm:$0xff]  ;;  %v33_v2 = vld [vmem:[%s3148_s3 + $0x18] sm:$0xff]  ;;  %v30_v5 = vld [vmem:[%s3148_s3] sm:$0xff]  ;;  %161 = vmatprep.mubr.f32.mxu0 %v2458_v7  ;;  %232 = vmatprep.mubr.f32.mxu1 %v2458_v7 }
   0x2   :  { %v35_v1 = vld [vmem:[%s3148_s3 + $0x28] sm:$0xff]  ;;  %v37_v4 = vld [vmem:[%s3148_s3 + $0x38] sm:$0xff]  ;;  %v34_v6 = vld [vmem:[%s3148_s3 + $0x20] sm:$0xff] }
   0x3   :  { %v2506_v3 = vpack.c.bf16 %v35_v1, %v31_v0  ;;  %v2519_v8 = vpack.c.bf16 %v37_v4, %v33_v2  ;;  %v2521_v9 = vpack.c.bf16 %v34_v6, %v30_v5  ;;  %v32_v10 = vld [vmem:[%s3148_s3 + $0x10] sm:$0xff]  ;;  %v39_v12 = vld [vmem:[%s3148_s3 + $0x48] sm:$0xff]  ;;  %v41_v15 = vld [vmem:[%s3148_s3 + $0x58] sm:$0xff] }
   0x4   :  { %v36_v11 = vld [vmem:[%s3148_s3 + $0x30] sm:$0xff]  ;;  %v43_v14 = vld [vmem:[%s3148_s3 + $0x68] sm:$0xff]  ;;  %v45_v16 = vld [vmem:[%s3148_s3 + $0x78] sm:$0xff] }
   0x5   :  { %1767 = vmatprep.subr.bf16.mxu0 %v2506_v3  ;;  %v2533_v13 = vpack.c.bf16 %v36_v11, %v32_v10  ;;  %1799 = vmatprep.subr.bf16.mxu1 %v2519_v8  ;;  %v2546_v17 = vpack.c.bf16 %v43_v14, %v39_v12  ;;  %v2548_v18 = vpack.c.bf16 %v45_v16, %v41_v15  ;;  %v38_v19 = vld [vmem:[%s3148_s3 + $0x40] sm:$0xff]  ;;  %v40_v21 = vld [vmem:[%s3148_s3 + $0x50] sm:$0xff]  ;;  %v47_v24 = vld [vmem:[%s3148_s3 + $0x88] sm:$0xff] }
   0x6   :  { %1769 = vmatpush1.bf16.msra.mxu0 %v2521_v9  ;;  %v42_v20 = vld [vmem:[%s3148_s3 + $0x60] sm:$0xff]  ;;  %v44_v23 = vld [vmem:[%s3148_s3 + $0x70] sm:$0xff]  ;;  %v51_v25 = vld [vmem:[%s3148_s3 + $0xa8] sm:$0xff] }
   0x7   :  { %1801 = vmatpush1.bf16.msra.mxu1 %v2533_v13  ;;  %v2560_v22 = vpack.c.bf16 %v42_v20, %v38_v19  ;;  %1771 = vmatprep.subr.bf16.mxu0 %v2546_v17  ;;  %v2573_v26 = vpack.c.bf16 %v44_v23, %v40_v21  ;;  %v2575_v27 = vpack.c.bf16 %v51_v25, %v47_v24  ;;  %v49_v28 = vld [vmem:[%s3148_s3 + $0x98] sm:$0xff]  ;;  %v46_v30 = vld [vmem:[%s3148_s3 + $0x80] sm:$0xff]  ;;  %v48_v33 = vld [vmem:[%s3148_s3 + $0x90] sm:$0xff] }
   0x8   :  { %1803 = vmatprep.subr.bf16.mxu1 %v2548_v18  ;;  %v53_v29 = vld [vmem:[%s3148_s3 + $0xb8] sm:$0xff]  ;;  %v50_v32 = vld [vmem:[%s3148_s3 + $0xa0] sm:$0xff]  ;;  %v52_v34 = vld [vmem:[%s3148_s3 + $0xb0] sm:$0xff] }
   0x9   :  { %v2586_v31 = vpack.c.bf16 %v53_v29, %v49_v28  ;;  %v2598_v35 = vpack.c.bf16 %v50_v32, %v46_v30  ;;  %v55_v36 = vld [vmem:[%s3148_s3 + $0xc8] sm:$0xff]  ;;  %v57_v38 = vld [vmem:[%s3148_s3 + $0xd8] sm:$0xff]  ;;  %v2611_v39 = vpack.c.bf16 %v52_v34, %v48_v33  ;;  %v54_v42 = vld [vmem:[%s3148_s3 + $0xc0] sm:$0xff] }
   0xa   :  { %1773 = vmatpush1.bf16.msra.mxu0 %v2560_v22  ;;  %v59_v37 = vld [vmem:[%s3148_s3 + $0xe8] sm:$0xff]  ;;  %v61_v41 = vld [vmem:[%s3148_s3 + $0xf8] sm:$0xff]  ;;  %v58_v43 = vld [vmem:[%s3148_s3 + $0xe0] sm:$0xff] }
   0xb   :  { %1805 = vmatpush1.bf16.msra.mxu1 %v2573_v26  ;;  %1775 = vmatprep.subr.bf16.mxu0 %v2575_v27  ;;  %v2613_v40 = vpack.c.bf16 %v59_v37, %v55_v36  ;;  %v2625_v44 = vpack.c.bf16 %v61_v41, %v57_v38  ;;  %v56_v45 = vld [vmem:[%s3148_s3 + $0xd0] sm:$0xff]  ;;  %v63_v47 = vld [vmem:[%s3148_s3 + $0x108] sm:$0xff]  ;;  %v65_v49 = vld [vmem:[%s3148_s3 + $0x118] sm:$0xff]  ;;  %v2646_v51 = vpack.c.bf16 %v58_v43, %v54_v42 }
   0xc   :  { %1807 = vmatprep.subr.bf16.mxu1 %v2586_v31  ;;  %v60_v46 = vld [vmem:[%s3148_s3 + $0xf0] sm:$0xff]  ;;  %v67_v48 = vld [vmem:[%s3148_s3 + $0x128] sm:$0xff]  ;;  %v69_v50 = vld [vmem:[%s3148_s3 + $0x138] sm:$0xff] }
   0xd   :  { %v2650_v52 = vpack.c.bf16 %v60_v46, %v56_v45  ;;  %v2652_v53 = vpack.c.bf16 %v67_v48, %v63_v47  ;;  %v62_v54 = vld [vmem:[%s3148_s3 + $0x100] sm:$0xff]  ;;  %v64_v56 = vld [vmem:[%s3148_s3 + $0x110] sm:$0xff]  ;;  %v2664_v57 = vpack.c.bf16 %v69_v50, %v65_v49  ;;  %v71_v59 = vld [vmem:[%s3148_s3 + $0x148] sm:$0xff] }
   0xe   :  { %1777 = vmatpush1.bf16.msra.mxu0 %v2598_v35  ;;  %v66_v55 = vld [vmem:[%s3148_s3 + $0x120] sm:$0xff]  ;;  %v68_v58 = vld [vmem:[%s3148_s3 + $0x130] sm:$0xff]  ;;  %v75_v60 = vld [vmem:[%s3148_s3 + $0x168] sm:$0xff] }
   0xf   :  { %1809 = vmatpush1.bf16.msra.mxu1 %v2611_v39  ;;  %1779 = vmatprep.subr.bf16.mxu0 %v2613_v40  ;;  %v73_v61 = vld [vmem:[%s3148_s3 + $0x158] sm:$0xff]  ;;  %v2682_v63 = vpack.c.bf16 %v66_v55, %v62_v54  ;;  %v2686_v0 = vpack.c.bf16 %v68_v58, %v64_v56  ;;  %v2688_v1 = vpack.c.bf16 %v75_v60, %v71_v59  ;;  %v70_v2 = vld [vmem:[%s3148_s3 + $0x140] sm:$0xff]  ;;  %v72_v5 = vld [vmem:[%s3148_s3 + $0x150] sm:$0xff] }
  0x10   :  { %1811 = vmatprep.subr.bf16.mxu1 %v2625_v44  ;;  %v77_v62 = vld [vmem:[%s3148_s3 + $0x178] sm:$0xff]  ;;  %v74_v4 = vld [vmem:[%s3148_s3 + $0x160] sm:$0xff]  ;;  %v76_v10 = vld [vmem:[%s3148_s3 + $0x170] sm:$0xff] }
  0x11   :  { %v2700_v6 = vpack.c.bf16 %v77_v62, %v73_v61  ;;  %v79_v11 = vld [vmem:[%s3148_s3 + $0x188] sm:$0xff]  ;;  %v81_v14 = vld [vmem:[%s3148_s3 + $0x198] sm:$0xff]  ;;  %v2718_v16 = vpack.c.bf16 %v74_v4, %v70_v2  ;;  %v78_v19 = vld [vmem:[%s3148_s3 + $0x180] sm:$0xff]  ;;  %v2728_v21 = vpack.c.bf16 %v76_v10, %v72_v5 }
  0x12   :  { %1781 = vmatpush1.bf16.msra.mxu0 %v2646_v51  ;;  %v83_v12 = vld [vmem:[%s3148_s3 + $0x1a8] sm:$0xff]  ;;  %v85_v15 = vld [vmem:[%s3148_s3 + $0x1b8] sm:$0xff]  ;;  %v82_v20 = vld [vmem:[%s3148_s3 + $0x1a0] sm:$0xff] }
  0x13   :  { %1813 = vmatpush1.bf16.msra.mxu1 %v2650_v52  ;;  %1783 = vmatprep.subr.bf16.mxu0 %v2652_v53  ;;  %v2730_v23 = vpack.c.bf16 %v83_v12, %v79_v11  ;;  %v80_v24 = vld [vmem:[%s3148_s3 + $0x190] sm:$0xff]  ;;  %v26_v25 = vld [vmem:[%s3146_s1] sm:$0x3] }
  0x14   :  { %1815 = vmatprep.subr.bf16.mxu1 %v2664_v57 }
  0x16   :  { %1785 = vmatpush1.bf16.msra.mxu0 %v2682_v63 }
  0x17   :  { %1817 = vmatpush1.bf16.msra.mxu1 %v2686_v0  ;;  %1787 = vmatprep.subr.bf16.mxu0 %v2688_v1 }
  0x18   :  { %13 = vsyncpa [#allocation5], 0  ;;  %1819 = vmatprep.subr.bf16.mxu1 %v2700_v6  ;;  %v2739_v28 = vpack.c.bf16 %v85_v15, %v81_v14  ;;  %v84_v29 = vld [vmem:[%s3148_s3 + $0x1b0] sm:$0xff]  ;;  %v87_v30 = vld [vmem:[%s3148_s3 + $0x1c8] sm:$0xff]  ;;  %27 = vst [vmem:[#allocation2] sm:$0x3] %v26_v25  ;;  %v2757_v36 = vpack.c.bf16 %v82_v20, %v78_v19  ;;  %v248_v56 = vlaneseq }
  0x19   :  { %v91_v32 = vld [vmem:[%s3148_s3 + $0x1e8] sm:$0xff]  ;;  %v89_v33 = vld [vmem:[%s3148_s3 + $0x1d8] sm:$0xff]  ;;  %v2761_v37 = vpack.c.bf16 %v84_v29, %v80_v24  ;;  %v86_v41 = vld [vmem:[%s3148_s3 + $0x1c0] sm:$0xff]  ;;  %v2459_v54 = vmov 1983009808  }
  0x1a   :  { %v93_v34 = vld [vmem:[%s3148_s3 + $0x1f8] sm:$0xff]  ;;  %1789 = vmatpush1.bf16.msra.mxu0 %v2718_v16  ;;  %v2763_v38 = vpack.c.bf16 %v91_v32, %v87_v30  ;;  %v90_v42 = vld [vmem:[%s3148_s3 + $0x1e0] sm:$0xff]  ;;  %v88_v45 = vld [vmem:[%s3148_s3 + $0x1d0] sm:$0xff]  ;;  %v246_v55 = vunpack.c.l.s4 %v2459_v54  ;;  %v249_v59 = vshrl.u32 %v248_v56, 7 }
  0x1b   :  { %1821 = vmatpush1.bf16.msra.mxu1 %v2728_v21  ;;  %1791 = vmatprep.subr.bf16.mxu0 %v2730_v23  ;;  %v2772_v43 = vpack.c.bf16 %v93_v34, %v89_v33  ;;  %v92_v46 = vld [vmem:[%s3148_s3 + $0x1f0] sm:$0xff]  ;;  %v2781_v47 = vpack.c.bf16 %v90_v42, %v86_v41  ;;  %v28_v50 = vld [vmem:[%s3147_s2] sm:$0x3] }
  0x1c   :  { %1823 = vmatprep.subr.bf16.mxu1 %v2739_v28  ;;  %v2785_v48 = vpack.c.bf16 %v92_v46, %v88_v45  ;;  %29 = vst [vmem:[#allocation4] sm:$0x3] %v28_v50  ;;  %v247_v58 = vunpack.c.0.s8 %v246_v55  ;;  %v96_v14 = vld [vmem:[%s3145_s0] sm:$0xff] }
  0x1e   :  { %1793 = vmatpush1.bf16.msra.mxu0 %v2757_v36  ;;  %v2829_v61 = vsub.s32 %v247_v58, %v249_v59 }
  0x1f   :  { %1825 = vmatpush1.bf16.msra.mxu1 %v2761_v37  ;;  %1795 = vmatprep.subr.bf16.mxu0 %v2763_v38  ;;  %v94_v49 = vld [vmem:[#allocation2] sm:$0x3] }
  0x20   :  { %1827 = vmatprep.subr.bf16.mxu1 %v2772_v43 }
  0x22   :  { %1797 = vmatpush1.bf16.msra.mxu0 %v2781_v47 }
  0x23   :  { %1829 = vmatpush1.bf16.msra.mxu1 %v2785_v48  ;;  %1831 = vmatprep.subr.bf16.mxu0 %v2506_v3 }
  0x24   :  { %1863 = vmatprep.subr.bf16.mxu1 %v2519_v8 }
  0x25   :  { %162 = vmatmul.mubr.f32.vlgmr.msra.gmra.mrb[0].mxu0 %v94_v49 }
  0x26   :  { %233 = vmatmul.mubr.f32.vlgmr.msra.gmra.mrb[0].mxu1 %v94_v49  ;;  %1833 = vmatpush1.bf16.msra.mxu0 %v2521_v9  ;;  %v95_v49 = vld [vmem:[#allocation4] sm:$0x3] }
  0x27   :  { %1865 = vmatpush1.bf16.msra.mxu1 %v2533_v13  ;;  %1835 = vmatprep.subr.bf16.mxu0 %v2546_v17 }
  0x28   :  { %1867 = vmatprep.subr.bf16.mxu1 %v2548_v18  ;;  %360 = vmatprep.mubr.f32.mxu0 %v2458_v7 }
  0x29   :  { %431 = vmatprep.mubr.f32.mxu1 %v2458_v7 }
  0x2a   :  { %1837 = vmatpush1.bf16.msra.mxu0 %v2560_v22 }
  0x2b   :  { %1869 = vmatpush1.bf16.msra.mxu1 %v2573_v26  ;;  %1839 = vmatprep.subr.bf16.mxu0 %v2575_v27 }
  0x2c   :  { %1871 = vmatprep.subr.bf16.mxu1 %v2586_v31 }
  0x2e   :  { %1841 = vmatpush1.bf16.msra.mxu0 %v2598_v35 }
  0x2f   :  { %1873 = vmatpush1.bf16.msra.mxu1 %v2611_v39  ;;  %1843 = vmatprep.subr.bf16.mxu0 %v2613_v40 }
  0x30   :  { %1875 = vmatprep.subr.bf16.mxu1 %v2625_v44 }
  0x32   :  { %1845 = vmatpush1.bf16.msra.mxu0 %v2646_v51 }
  0x33   :  { %1877 = vmatpush1.bf16.msra.mxu1 %v2650_v52  ;;  %1847 = vmatprep.subr.bf16.mxu0 %v2652_v53 }
  0x34   :  { %1879 = vmatprep.subr.bf16.mxu1 %v2664_v57 }
  0x36   :  { %1849 = vmatpush1.bf16.msra.mxu0 %v2682_v63 }
  0x37   :  { %1881 = vmatpush1.bf16.msra.mxu1 %v2686_v0  ;;  %1851 = vmatprep.subr.bf16.mxu0 %v2688_v1 }
  0x38   :  { %1883 = vmatprep.subr.bf16.mxu1 %v2700_v6 }
  0x3a   :  { %1853 = vmatpush1.bf16.msra.mxu0 %v2718_v16 }
  0x3b   :  { %1885 = vmatpush1.bf16.msra.mxu1 %v2728_v21  ;;  %1855 = vmatprep.subr.bf16.mxu0 %v2730_v23 }
  0x3c   :  { %1887 = vmatprep.subr.bf16.mxu1 %v2739_v28 }
  0x3e   :  { %1857 = vmatpush1.bf16.msra.mxu0 %v2757_v36 }
  0x3f   :  { %1889 = vmatpush1.bf16.msra.mxu1 %v2761_v37  ;;  %1859 = vmatprep.subr.bf16.mxu0 %v2763_v38 }
  0x40   :  { %1891 = vmatprep.subr.bf16.mxu1 %v2772_v43 }
  0x42   :  { %1861 = vmatpush1.bf16.msra.mxu0 %v2781_v47 }
  0x43   :  { %1893 = vmatpush1.bf16.msra.mxu1 %v2785_v48  ;;  %1895 = vmatprep.subr.bf16.mxu0 %v2506_v3 }
  0x44   :  { %1927 = vmatprep.subr.bf16.mxu1 %v2519_v8 }
  0xf8   :  { %v163_v60 = vpop.f32.mrb[0].mxu0 }
  0xf9   :  { %v234_v62 = vpop.f32.mrb[0].mxu1  ;;  %v165_v2 = vpop.f32.mrb[1].mxu0 }
  0xfa   :  { %v243_v4 = vcombine.low %v163_v60, %v165_v2  ;;  %v236_v5 = vpop.f32.mrb[1].mxu1 }
  0xfb   :  { %v244_v10 = vcombine.low %v234_v62, %v236_v5 }
  0xfc   :  { %v251_v11 = vrot.slane %v243_v4, %v2829_v61 }
  0xfd   :  { %v258_v12 = vrot.slane %v244_v10, %v2829_v61 }
  0xff   :  { %v259_v15 = vcombine.low %v251_v11, %v258_v12 }
 0x101   :  { %v261_v19 = vadd.f32 %v259_v15, %v96_v14 }
 0x103   :  { %v1728_v20 = vmul.f32 -1.442695, %v261_v19  ;;  %v269_v24 = vrot.slane %v261_v19, 2  ;;  %v280_v29 = vrot.slane %v261_v19, 6  ;;  %v277_v33 = vrot.slane %v261_v19, 4 }
 0x105   :  { %2282 = vpow2.f32 %v1728_v20  ;;  %v1729_v25 = vmul.f32 -1.442695, %v269_v24  ;;  %v1730_v30 = vmul.f32 -1.442695, %v280_v29  ;;  %v1731_v20 = vld [vmem:[%s3145_s0 + $0x8] sm:$0xff] }
 0x107   :  { %2284 = vpow2.f32 %v1729_v25 }
 0x108   :  { %2286 = vpow2.f32 %v1730_v30 }
 0x10f   :  { %v2283_v32 = vpop.eup %2282 }
 0x110   :  { %v265_v34 = vadd.f32 1.0, %v2283_v32 }
 0x111   :  { %v2285_v41 = vpop.eup %2284 }
 0x112   :  { %2288 = vrcp.f32 %v265_v34  ;;  %v274_v42 = vadd.f32 1.0, %v2285_v41  ;;  %v2287_v45 = vpop.eup %2286 }
 0x113   :  { %2290 = vtanh.f32 %v277_v33  ;;  %v285_v55 = vadd.f32 1.0, %v2287_v45 }
 0x114   :  { %2292 = vrcp.f32 %v274_v42 }
 0x115   :  { %2294 = vrcp.f32 %v285_v55 }
 0x11c   :  { %v2289_v46 = vpop.eup %2288 }
 0x11d   :  { %v2291_v50 = vpop.eup %2290  ;;  %v288_v56 = vmul.f32 %v2289_v46, %v95_v49 }
 0x11e   :  { %v2293_v54 = vpop.eup %2292 }
 0x11f   :  { %v289_v58 = vmul.f32 %v2293_v54, %v2291_v50  ;;  %v2295_v60 = vpop.eup %2294 }
 0x121   :  { %v2836_v59 = vadd.f32 %v289_v58, %v288_v56 }
 0x123   :  { %2296 = vtanh.f32 %v2836_v59 }
 0x12d   :  { %v2297_v62 = vpop.eup %2296 }
 0x12e   :  { %v292_v2 = vmul.f32 %v2297_v62, %v2295_v60 }
 0x130   :  { %293 = vst [vmem:[%s3149_s4] sm:$0x3] %v292_v2  ;;  %361 = vmatmul.mubr.f32.vlgmr.msra.gmra.mrb[2].mxu0 %v292_v2  ;;  %432 = vmatmul.mubr.f32.vlgmr.msra.gmra.mrb[2].mxu1 %v292_v2 }
 0x131   :  { %1897 = vmatpush1.bf16.msra.mxu0 %v2521_v9  ;;  %1929 = vmatpush1.bf16.msra.mxu1 %v2533_v13 }
 0x132   :  { %1899 = vmatprep.subr.bf16.mxu0 %v2546_v17  ;;  %1931 = vmatprep.subr.bf16.mxu1 %v2548_v18 }
 0x133   :  { %560 = vmatprep.mubr.f32.mxu0 %v2458_v7  ;;  %631 = vmatprep.mubr.f32.mxu1 %v2458_v7 }
 0x135   :  { %1901 = vmatpush1.bf16.msra.mxu0 %v2560_v22  ;;  %1933 = vmatpush1.bf16.msra.mxu1 %v2573_v26 }
 0x136   :  { %1903 = vmatprep.subr.bf16.mxu0 %v2575_v27  ;;  %1935 = vmatprep.subr.bf16.mxu1 %v2586_v31 }
 0x139   :  { %1905 = vmatpush1.bf16.msra.mxu0 %v2598_v35  ;;  %1937 = vmatpush1.bf16.msra.mxu1 %v2611_v39 }
 0x13a   :  { %1907 = vmatprep.subr.bf16.mxu0 %v2613_v40  ;;  %1939 = vmatprep.subr.bf16.mxu1 %v2625_v44 }
 0x13d   :  { %1909 = vmatpush1.bf16.msra.mxu0 %v2646_v51  ;;  %1941 = vmatpush1.bf16.msra.mxu1 %v2650_v52 }
 0x13e   :  { %1911 = vmatprep.subr.bf16.mxu0 %v2652_v53  ;;  %1943 = vmatprep.subr.bf16.mxu1 %v2664_v57 }
 0x141   :  { %1913 = vmatpush1.bf16.msra.mxu0 %v2682_v63  ;;  %1945 = vmatpush1.bf16.msra.mxu1 %v2686_v0 }
 0x142   :  { %1915 = vmatprep.subr.bf16.mxu0 %v2688_v1  ;;  %1947 = vmatprep.subr.bf16.mxu1 %v2700_v6 }
 0x145   :  { %1917 = vmatpush1.bf16.msra.mxu0 %v2718_v16  ;;  %1949 = vmatpush1.bf16.msra.mxu1 %v2728_v21 }
 0x146   :  { %1919 = vmatprep.subr.bf16.mxu0 %v2730_v23  ;;  %1951 = vmatprep.subr.bf16.mxu1 %v2739_v28 }
 0x149   :  { %1921 = vmatpush1.bf16.msra.mxu0 %v2757_v36  ;;  %1953 = vmatpush1.bf16.msra.mxu1 %v2761_v37 }
 0x14a   :  { %1923 = vmatprep.subr.bf16.mxu0 %v2763_v38  ;;  %1955 = vmatprep.subr.bf16.mxu1 %v2772_v43 }
 0x14d   :  { %1925 = vmatpush1.bf16.msra.mxu0 %v2781_v47  ;;  %1957 = vmatpush1.bf16.msra.mxu1 %v2785_v48 }
 0x14e   :  { %1959 = vmatprep.subr.bf16.mxu0 %v2506_v3  ;;  %1991 = vmatprep.subr.bf16.mxu1 %v2519_v8 }
 0x203   :  { %v362_v4 = vpop.f32.mrb[2].mxu0  ;;  %v433_v5 = vpop.f32.mrb[2].mxu1 }
 0x204   :  { %v364_v10 = vpop.f32.mrb[3].mxu0  ;;  %v435_v11 = vpop.f32.mrb[3].mxu1 }
 0x205   :  { %v442_v12 = vcombine.low %v362_v4, %v364_v10  ;;  %v443_v14 = vcombine.low %v433_v5, %v435_v11 }
 0x207   :  { %v450_v15 = vrot.slane %v442_v12, %v2829_v61  ;;  %v457_v19 = vrot.slane %v443_v14, %v2829_v61 }
 0x209   :  { %v458_v24 = vcombine.low %v450_v15, %v457_v19 }
 0x20b   :  { %v460_v25 = vadd.f32 %v1731_v20, %v458_v24 }
 0x20d   :  { %v1732_v29 = vmul.f32 -1.442695, %v460_v25  ;;  %v468_v30 = vrot.slane %v460_v25, 2  ;;  %v479_v33 = vrot.slane %v460_v25, 6  ;;  %v476_v42 = vrot.slane %v460_v25, 4  ;;  %v1736_v25 = vld [vmem:[%s3145_s0 + $0x10] sm:$0xff] }
 0x20f   :  { %2298 = vpow2.f32 %v1732_v29  ;;  %v1733_v32 = vmul.f32 -1.442695, %v468_v30  ;;  %v1734_v34 = vmul.f32 -1.442695, %v479_v33 }
 0x211   :  { %2300 = vpow2.f32 %v1733_v32 }
 0x212   :  { %2302 = vpow2.f32 %v1734_v34 }
 0x219   :  { %v2299_v41 = vpop.eup %2298 }
 0x21a   :  { %v464_v45 = vadd.f32 1.0, %v2299_v41 }
 0x21b   :  { %v2301_v46 = vpop.eup %2300 }
 0x21c   :  { %2304 = vrcp.f32 %v464_v45  ;;  %v473_v49 = vadd.f32 1.0, %v2301_v46  ;;  %v2303_v50 = vpop.eup %2302 }
 0x21d   :  { %2306 = vtanh.f32 %v476_v42  ;;  %v484_v58 = vadd.f32 1.0, %v2303_v50 }
 0x21e   :  { %2308 = vrcp.f32 %v473_v49 }
 0x21f   :  { %2310 = vrcp.f32 %v484_v58 }
 0x226   :  { %v2305_v54 = vpop.eup %2304 }
 0x227   :  { %v2307_v55 = vpop.eup %2306  ;;  %v487_v60 = vmul.f32 %v2305_v54, %v2836_v59 }
 0x228   :  { %v2309_v56 = vpop.eup %2308 }
 0x229   :  { %v488_v62 = vmul.f32 %v2309_v56, %v2307_v55  ;;  %v2311_v4 = vpop.eup %2310 }
 0x22b   :  { %v2882_v2 = vadd.f32 %v488_v62, %v487_v60 }
 0x22d   :  { %2312 = vtanh.f32 %v2882_v2 }
 0x237   :  { %v2313_v5 = vpop.eup %2312 }
 0x238   :  { %v491_v10 = vmul.f32 %v2313_v5, %v2311_v4 }
 0x23a   :  { %1735 = vst [vmem:[%s3149_s4 + $0x2] sm:$0x3] %v491_v10  ;;  %561 = vmatmul.mubr.f32.vlgmr.msra.gmra.mrb[4].mxu0 %v491_v10  ;;  %632 = vmatmul.mubr.f32.vlgmr.msra.gmra.mrb[4].mxu1 %v491_v10 }
 0x23b   :  { %1961 = vmatpush1.bf16.msra.mxu0 %v2521_v9  ;;  %1993 = vmatpush1.bf16.msra.mxu1 %v2533_v13 }
 0x23c   :  { %1963 = vmatprep.subr.bf16.mxu0 %v2546_v17  ;;  %1995 = vmatprep.subr.bf16.mxu1 %v2548_v18 }
 0x23d   :  { %760 = vmatprep.mubr.f32.mxu0 %v2458_v7  ;;  %831 = vmatprep.mubr.f32.mxu1 %v2458_v7 }
 0x23f   :  { %1965 = vmatpush1.bf16.msra.mxu0 %v2560_v22  ;;  %1997 = vmatpush1.bf16.msra.mxu1 %v2573_v26 }
 0x240   :  { %1967 = vmatprep.subr.bf16.mxu0 %v2575_v27  ;;  %1999 = vmatprep.subr.bf16.mxu1 %v2586_v31 }
 0x243   :  { %1969 = vmatpush1.bf16.msra.mxu0 %v2598_v35  ;;  %2001 = vmatpush1.bf16.msra.mxu1 %v2611_v39 }
 0x244   :  { %1971 = vmatprep.subr.bf16.mxu0 %v2613_v40  ;;  %2003 = vmatprep.subr.bf16.mxu1 %v2625_v44 }
 0x247   :  { %1973 = vmatpush1.bf16.msra.mxu0 %v2646_v51  ;;  %2005 = vmatpush1.bf16.msra.mxu1 %v2650_v52 }
 0x248   :  { %1975 = vmatprep.subr.bf16.mxu0 %v2652_v53  ;;  %2007 = vmatprep.subr.bf16.mxu1 %v2664_v57 }
 0x24b   :  { %1977 = vmatpush1.bf16.msra.mxu0 %v2682_v63  ;;  %2009 = vmatpush1.bf16.msra.mxu1 %v2686_v0 }
 0x24c   :  { %1979 = vmatprep.subr.bf16.mxu0 %v2688_v1  ;;  %2011 = vmatprep.subr.bf16.mxu1 %v2700_v6 }
 0x24f   :  { %1981 = vmatpush1.bf16.msra.mxu0 %v2718_v16  ;;  %2013 = vmatpush1.bf16.msra.mxu1 %v2728_v21 }
 0x250   :  { %1983 = vmatprep.subr.bf16.mxu0 %v2730_v23  ;;  %2015 = vmatprep.subr.bf16.mxu1 %v2739_v28 }
 0x253   :  { %1985 = vmatpush1.bf16.msra.mxu0 %v2757_v36  ;;  %2017 = vmatpush1.bf16.msra.mxu1 %v2761_v37 }
 0x254   :  { %1987 = vmatprep.subr.bf16.mxu0 %v2763_v38  ;;  %2019 = vmatprep.subr.bf16.mxu1 %v2772_v43 }
 0x257   :  { %1989 = vmatpush1.bf16.msra.mxu0 %v2781_v47  ;;  %2021 = vmatpush1.bf16.msra.mxu1 %v2785_v48 }
 0x258   :  { %2023 = vmatprep.subr.bf16.mxu0 %v2506_v3  ;;  %2055 = vmatprep.subr.bf16.mxu1 %v2519_v8 }
 0x30d   :  { %v562_v59 = vpop.f32.mrb[4].mxu0  ;;  %v633_v11 = vpop.f32.mrb[4].mxu1 }
 0x30e   :  { %v564_v12 = vpop.f32.mrb[5].mxu0  ;;  %v635_v14 = vpop.f32.mrb[5].mxu1 }
 0x30f   :  { %v642_v15 = vcombine.low %v562_v59, %v564_v12  ;;  %v643_v19 = vcombine.low %v633_v11, %v635_v14 }
 0x311   :  { %v650_v20 = vrot.slane %v642_v15, %v2829_v61  ;;  %v657_v24 = vrot.slane %v643_v19, %v2829_v61 }
 0x313   :  { %v658_v29 = vcombine.low %v650_v20, %v657_v24 }
 0x315   :  { %v660_v30 = vadd.f32 %v1736_v25, %v658_v29 }
 0x317   :  { %v1737_v32 = vmul.f32 -1.442695, %v660_v30  ;;  %v668_v33 = vrot.slane %v660_v30, 2  ;;  %v679_v41 = vrot.slane %v660_v30, 6  ;;  %v676_v46 = vrot.slane %v660_v30, 4  ;;  %v1741_v30 = vld [vmem:[%s3145_s0 + $0x18] sm:$0xff] }
 0x319   :  { %2314 = vpow2.f32 %v1737_v32  ;;  %v1738_v34 = vmul.f32 -1.442695, %v668_v33  ;;  %v1739_v42 = vmul.f32 -1.442695, %v679_v41 }
 0x31b   :  { %2316 = vpow2.f32 %v1738_v34 }
 0x31c   :  { %2318 = vpow2.f32 %v1739_v42 }
 0x323   :  { %v2315_v45 = vpop.eup %2314 }
 0x324   :  { %v664_v49 = vadd.f32 1.0, %v2315_v45 }
 0x325   :  { %v2317_v50 = vpop.eup %2316 }
 0x326   :  { %2320 = vrcp.f32 %v664_v49  ;;  %v673_v54 = vadd.f32 1.0, %v2317_v50  ;;  %v2319_v55 = vpop.eup %2318 }
 0x327   :  { %2322 = vtanh.f32 %v676_v46  ;;  %v684_v62 = vadd.f32 1.0, %v2319_v55 }
 0x328   :  { %2324 = vrcp.f32 %v673_v54 }
 0x329   :  { %2326 = vrcp.f32 %v684_v62 }
 0x330   :  { %v2321_v56 = vpop.eup %2320 }
 0x331   :  { %v2323_v58 = vpop.eup %2322  ;;  %v687_v4 = vmul.f32 %v2321_v56, %v2882_v2 }
 0x332   :  { %v2325_v60 = vpop.eup %2324 }
 0x333   :  { %v688_v5 = vmul.f32 %v2325_v60, %v2323_v58  ;;  %v2327_v59 = vpop.eup %2326 }
 0x335   :  { %v2928_v10 = vadd.f32 %v688_v5, %v687_v4 }
 0x337   :  { %2328 = vtanh.f32 %v2928_v10 }
 0x341   :  { %v2329_v11 = vpop.eup %2328 }
 0x342   :  { %v691_v12 = vmul.f32 %v2329_v11, %v2327_v59 }
 0x344   :  { %1740 = vst [vmem:[%s3149_s4 + $0x4] sm:$0x3] %v691_v12  ;;  %761 = vmatmul.mubr.f32.vlgmr.msra.gmra.mrb[6].mxu0 %v691_v12  ;;  %832 = vmatmul.mubr.f32.vlgmr.msra.gmra.mrb[6].mxu1 %v691_v12 }
 0x345   :  { %2025 = vmatpush1.bf16.msra.mxu0 %v2521_v9  ;;  %2057 = vmatpush1.bf16.msra.mxu1 %v2533_v13 }
 0x346   :  { %2027 = vmatprep.subr.bf16.mxu0 %v2546_v17  ;;  %2059 = vmatprep.subr.bf16.mxu1 %v2548_v18 }
 0x347   :  { %960 = vmatprep.mubr.f32.mxu0 %v2458_v7  ;;  %1031 = vmatprep.mubr.f32.mxu1 %v2458_v7 }
 0x349   :  { %2029 = vmatpush1.bf16.msra.mxu0 %v2560_v22  ;;  %2061 = vmatpush1.bf16.msra.mxu1 %v2573_v26 }
 0x34a   :  { %2031 = vmatprep.subr.bf16.mxu0 %v2575_v27  ;;  %2063 = vmatprep.subr.bf16.mxu1 %v2586_v31 }
 0x34d   :  { %2033 = vmatpush1.bf16.msra.mxu0 %v2598_v35  ;;  %2065 = vmatpush1.bf16.msra.mxu1 %v2611_v39 }
 0x34e   :  { %2035 = vmatprep.subr.bf16.mxu0 %v2613_v40  ;;  %2067 = vmatprep.subr.bf16.mxu1 %v2625_v44 }
 0x351   :  { %2037 = vmatpush1.bf16.msra.mxu0 %v2646_v51  ;;  %2069 = vmatpush1.bf16.msra.mxu1 %v2650_v52 }
 0x352   :  { %2039 = vmatprep.subr.bf16.mxu0 %v2652_v53  ;;  %2071 = vmatprep.subr.bf16.mxu1 %v2664_v57 }
 0x355   :  { %2041 = vmatpush1.bf16.msra.mxu0 %v2682_v63  ;;  %2073 = vmatpush1.bf16.msra.mxu1 %v2686_v0 }
 0x356   :  { %2043 = vmatprep.subr.bf16.mxu0 %v2688_v1  ;;  %2075 = vmatprep.subr.bf16.mxu1 %v2700_v6 }
 0x359   :  { %2045 = vmatpush1.bf16.msra.mxu0 %v2718_v16  ;;  %2077 = vmatpush1.bf16.msra.mxu1 %v2728_v21 }
 0x35a   :  { %2047 = vmatprep.subr.bf16.mxu0 %v2730_v23  ;;  %2079 = vmatprep.subr.bf16.mxu1 %v2739_v28 }
 0x35d   :  { %2049 = vmatpush1.bf16.msra.mxu0 %v2757_v36  ;;  %2081 = vmatpush1.bf16.msra.mxu1 %v2761_v37 }
 0x35e   :  { %2051 = vmatprep.subr.bf16.mxu0 %v2763_v38  ;;  %2083 = vmatprep.subr.bf16.mxu1 %v2772_v43 }
 0x361   :  { %2053 = vmatpush1.bf16.msra.mxu0 %v2781_v47  ;;  %2085 = vmatpush1.bf16.msra.mxu1 %v2785_v48 }
 0x362   :  { %2087 = vmatprep.subr.bf16.mxu0 %v2506_v3  ;;  %2119 = vmatprep.subr.bf16.mxu1 %v2519_v8 }
 0x417   :  { %v762_v2 = vpop.f32.mrb[6].mxu0  ;;  %v833_v14 = vpop.f32.mrb[6].mxu1 }
 0x418   :  { %v764_v15 = vpop.f32.mrb[7].mxu0  ;;  %v835_v19 = vpop.f32.mrb[7].mxu1 }
 0x419   :  { %v842_v20 = vcombine.low %v762_v2, %v764_v15  ;;  %v843_v24 = vcombine.low %v833_v14, %v835_v19 }
 0x41b   :  { %v850_v25 = vrot.slane %v842_v20, %v2829_v61  ;;  %v857_v29 = vrot.slane %v843_v24, %v2829_v61 }
 0x41d   :  { %v858_v32 = vcombine.low %v850_v25, %v857_v29 }
 0x41f   :  { %v860_v33 = vadd.f32 %v1741_v30, %v858_v32 }
 0x421   :  { %v1742_v34 = vmul.f32 -1.442695, %v860_v33  ;;  %v868_v41 = vrot.slane %v860_v33, 2  ;;  %v879_v45 = vrot.slane %v860_v33, 6  ;;  %v876_v50 = vrot.slane %v860_v33, 4  ;;  %v1746_v33 = vld [vmem:[%s3145_s0 + $0x20] sm:$0xff] }
 0x423   :  { %2330 = vpow2.f32 %v1742_v34  ;;  %v1743_v42 = vmul.f32 -1.442695, %v868_v41  ;;  %v1744_v46 = vmul.f32 -1.442695, %v879_v45 }
 0x425   :  { %2332 = vpow2.f32 %v1743_v42 }
 0x426   :  { %2334 = vpow2.f32 %v1744_v46 }
 0x42d   :  { %v2331_v49 = vpop.eup %2330 }
 0x42e   :  { %v864_v54 = vadd.f32 1.0, %v2331_v49 }
 0x42f   :  { %v2333_v55 = vpop.eup %2332 }
 0x430   :  { %2336 = vrcp.f32 %v864_v54  ;;  %v873_v56 = vadd.f32 1.0, %v2333_v55  ;;  %v2335_v58 = vpop.eup %2334 }
 0x431   :  { %2338 = vtanh.f32 %v876_v50  ;;  %v884_v5 = vadd.f32 1.0, %v2335_v58 }
 0x432   :  { %2340 = vrcp.f32 %v873_v56 }
 0x433   :  { %2342 = vrcp.f32 %v884_v5 }
 0x43a   :  { %v2337_v60 = vpop.eup %2336 }
 0x43b   :  { %v2339_v62 = vpop.eup %2338  ;;  %v887_v59 = vmul.f32 %v2337_v60, %v2928_v10 }
 0x43c   :  { %v2341_v4 = vpop.eup %2340 }
 0x43d   :  { %v888_v11 = vmul.f32 %v2341_v4, %v2339_v62  ;;  %v2343_v2 = vpop.eup %2342 }
 0x43f   :  { %v2974_v12 = vadd.f32 %v888_v11, %v887_v59 }
 0x441   :  { %2344 = vtanh.f32 %v2974_v12 }
 0x44b   :  { %v2345_v14 = vpop.eup %2344 }
 0x44c   :  { %v891_v15 = vmul.f32 %v2345_v14, %v2343_v2 }
 0x44e   :  { %1745 = vst [vmem:[%s3149_s4 + $0x6] sm:$0x3] %v891_v15  ;;  %961 = vmatmul.mubr.f32.vlgmr.msra.gmra.mrb[8].mxu0 %v891_v15  ;;  %1032 = vmatmul.mubr.f32.vlgmr.msra.gmra.mrb[8].mxu1 %v891_v15 }
 0x44f   :  { %2089 = vmatpush1.bf16.msra.mxu0 %v2521_v9  ;;  %2121 = vmatpush1.bf16.msra.mxu1 %v2533_v13 }
 0x450   :  { %2091 = vmatprep.subr.bf16.mxu0 %v2546_v17  ;;  %2123 = vmatprep.subr.bf16.mxu1 %v2548_v18 }
 0x451   :  { %1160 = vmatprep.mubr.f32.mxu0 %v2458_v7  ;;  %1231 = vmatprep.mubr.f32.mxu1 %v2458_v7 }
 0x453   :  { %2093 = vmatpush1.bf16.msra.mxu0 %v2560_v22  ;;  %2125 = vmatpush1.bf16.msra.mxu1 %v2573_v26 }
 0x454   :  { %2095 = vmatprep.subr.bf16.mxu0 %v2575_v27  ;;  %2127 = vmatprep.subr.bf16.mxu1 %v2586_v31 }
 0x457   :  { %2097 = vmatpush1.bf16.msra.mxu0 %v2598_v35  ;;  %2129 = vmatpush1.bf16.msra.mxu1 %v2611_v39 }
 0x458   :  { %2099 = vmatprep.subr.bf16.mxu0 %v2613_v40  ;;  %2131 = vmatprep.subr.bf16.mxu1 %v2625_v44 }
 0x45b   :  { %2101 = vmatpush1.bf16.msra.mxu0 %v2646_v51  ;;  %2133 = vmatpush1.bf16.msra.mxu1 %v2650_v52 }
 0x45c   :  { %2103 = vmatprep.subr.bf16.mxu0 %v2652_v53  ;;  %2135 = vmatprep.subr.bf16.mxu1 %v2664_v57 }
 0x45f   :  { %2105 = vmatpush1.bf16.msra.mxu0 %v2682_v63  ;;  %2137 = vmatpush1.bf16.msra.mxu1 %v2686_v0 }
 0x460   :  { %2107 = vmatprep.subr.bf16.mxu0 %v2688_v1  ;;  %2139 = vmatprep.subr.bf16.mxu1 %v2700_v6 }
 0x463   :  { %2109 = vmatpush1.bf16.msra.mxu0 %v2718_v16  ;;  %2141 = vmatpush1.bf16.msra.mxu1 %v2728_v21 }
 0x464   :  { %2111 = vmatprep.subr.bf16.mxu0 %v2730_v23  ;;  %2143 = vmatprep.subr.bf16.mxu1 %v2739_v28 }
 0x467   :  { %2113 = vmatpush1.bf16.msra.mxu0 %v2757_v36  ;;  %2145 = vmatpush1.bf16.msra.mxu1 %v2761_v37 }
 0x468   :  { %2115 = vmatprep.subr.bf16.mxu0 %v2763_v38  ;;  %2147 = vmatprep.subr.bf16.mxu1 %v2772_v43 }
 0x46b   :  { %2117 = vmatpush1.bf16.msra.mxu0 %v2781_v47  ;;  %2149 = vmatpush1.bf16.msra.mxu1 %v2785_v48 }
 0x46c   :  { %2151 = vmatprep.subr.bf16.mxu0 %v2506_v3  ;;  %2183 = vmatprep.subr.bf16.mxu1 %v2519_v8 }
 0x521   :  { %v962_v10 = vpop.f32.mrb[8].mxu0  ;;  %v1033_v19 = vpop.f32.mrb[8].mxu1 }
 0x522   :  { %v964_v20 = vpop.f32.mrb[9].mxu0  ;;  %v1035_v24 = vpop.f32.mrb[9].mxu1 }
 0x523   :  { %v1042_v25 = vcombine.low %v962_v10, %v964_v20  ;;  %v1043_v29 = vcombine.low %v1033_v19, %v1035_v24 }
 0x525   :  { %v1050_v30 = vrot.slane %v1042_v25, %v2829_v61  ;;  %v1057_v32 = vrot.slane %v1043_v29, %v2829_v61 }
 0x527   :  { %v1058_v34 = vcombine.low %v1050_v30, %v1057_v32 }
 0x529   :  { %v1060_v41 = vadd.f32 %v1746_v33, %v1058_v34 }
 0x52b   :  { %v1747_v42 = vmul.f32 -1.442695, %v1060_v41  ;;  %v1068_v45 = vrot.slane %v1060_v41, 2  ;;  %v1079_v49 = vrot.slane %v1060_v41, 6  ;;  %v1076_v55 = vrot.slane %v1060_v41, 4  ;;  %v1751_v41 = vld [vmem:[%s3145_s0 + $0x28] sm:$0xff] }
 0x52d   :  { %2346 = vpow2.f32 %v1747_v42  ;;  %v1748_v46 = vmul.f32 -1.442695, %v1068_v45  ;;  %v1749_v50 = vmul.f32 -1.442695, %v1079_v49 }
 0x52f   :  { %2348 = vpow2.f32 %v1748_v46 }
 0x530   :  { %2350 = vpow2.f32 %v1749_v50 }
 0x537   :  { %v2347_v54 = vpop.eup %2346 }
 0x538   :  { %v1064_v56 = vadd.f32 1.0, %v2347_v54 }
 0x539   :  { %v2349_v58 = vpop.eup %2348 }
 0x53a   :  { %2352 = vrcp.f32 %v1064_v56  ;;  %v1073_v60 = vadd.f32 1.0, %v2349_v58  ;;  %v2351_v62 = vpop.eup %2350 }
 0x53b   :  { %2354 = vtanh.f32 %v1076_v55  ;;  %v1084_v11 = vadd.f32 1.0, %v2351_v62 }
 0x53c   :  { %2356 = vrcp.f32 %v1073_v60 }
 0x53d   :  { %2358 = vrcp.f32 %v1084_v11 }
 0x544   :  { %v2353_v4 = vpop.eup %2352 }
 0x545   :  { %v2355_v5 = vpop.eup %2354  ;;  %v1087_v2 = vmul.f32 %v2353_v4, %v2974_v12 }
 0x546   :  { %v2357_v59 = vpop.eup %2356 }
 0x547   :  { %v1088_v14 = vmul.f32 %v2357_v59, %v2355_v5  ;;  %v2359_v10 = vpop.eup %2358 }
 0x549   :  { %v3020_v15 = vadd.f32 %v1088_v14, %v1087_v2 }
 0x54b   :  { %2360 = vtanh.f32 %v3020_v15 }
 0x555   :  { %v2361_v19 = vpop.eup %2360 }
 0x556   :  { %v1091_v20 = vmul.f32 %v2361_v19, %v2359_v10 }
 0x558   :  { %1750 = vst [vmem:[%s3149_s4 + $0x8] sm:$0x3] %v1091_v20  ;;  %1161 = vmatmul.mubr.f32.vlgmr.msra.gmra.mrb[10].mxu0 %v1091_v20  ;;  %1232 = vmatmul.mubr.f32.vlgmr.msra.gmra.mrb[10].mxu1 %v1091_v20 }
 0x559   :  { %2153 = vmatpush1.bf16.msra.mxu0 %v2521_v9  ;;  %2185 = vmatpush1.bf16.msra.mxu1 %v2533_v13 }
 0x55a   :  { %2155 = vmatprep.subr.bf16.mxu0 %v2546_v17  ;;  %2187 = vmatprep.subr.bf16.mxu1 %v2548_v18 }
 0x55b   :  { %1360 = vmatprep.mubr.f32.mxu0 %v2458_v7  ;;  %1431 = vmatprep.mubr.f32.mxu1 %v2458_v7 }
 0x55d   :  { %2157 = vmatpush1.bf16.msra.mxu0 %v2560_v22  ;;  %2189 = vmatpush1.bf16.msra.mxu1 %v2573_v26 }
 0x55e   :  { %2159 = vmatprep.subr.bf16.mxu0 %v2575_v27  ;;  %2191 = vmatprep.subr.bf16.mxu1 %v2586_v31 }
 0x561   :  { %2161 = vmatpush1.bf16.msra.mxu0 %v2598_v35  ;;  %2193 = vmatpush1.bf16.msra.mxu1 %v2611_v39 }
 0x562   :  { %2163 = vmatprep.subr.bf16.mxu0 %v2613_v40  ;;  %2195 = vmatprep.subr.bf16.mxu1 %v2625_v44 }
 0x565   :  { %2165 = vmatpush1.bf16.msra.mxu0 %v2646_v51  ;;  %2197 = vmatpush1.bf16.msra.mxu1 %v2650_v52 }
 0x566   :  { %2167 = vmatprep.subr.bf16.mxu0 %v2652_v53  ;;  %2199 = vmatprep.subr.bf16.mxu1 %v2664_v57 }
 0x569   :  { %2169 = vmatpush1.bf16.msra.mxu0 %v2682_v63  ;;  %2201 = vmatpush1.bf16.msra.mxu1 %v2686_v0 }
 0x56a   :  { %2171 = vmatprep.subr.bf16.mxu0 %v2688_v1  ;;  %2203 = vmatprep.subr.bf16.mxu1 %v2700_v6 }
 0x56d   :  { %2173 = vmatpush1.bf16.msra.mxu0 %v2718_v16  ;;  %2205 = vmatpush1.bf16.msra.mxu1 %v2728_v21 }
 0x56e   :  { %2175 = vmatprep.subr.bf16.mxu0 %v2730_v23  ;;  %2207 = vmatprep.subr.bf16.mxu1 %v2739_v28 }
 0x571   :  { %2177 = vmatpush1.bf16.msra.mxu0 %v2757_v36  ;;  %2209 = vmatpush1.bf16.msra.mxu1 %v2761_v37 }
 0x572   :  { %2179 = vmatprep.subr.bf16.mxu0 %v2763_v38  ;;  %2211 = vmatprep.subr.bf16.mxu1 %v2772_v43 }
 0x575   :  { %2181 = vmatpush1.bf16.msra.mxu0 %v2781_v47  ;;  %2213 = vmatpush1.bf16.msra.mxu1 %v2785_v48 }
 0x576   :  { %2215 = vmatprep.subr.bf16.mxu0 %v2506_v3  ;;  %2247 = vmatprep.subr.bf16.mxu1 %v2519_v8 }
 0x62b   :  { %v1162_v12 = vpop.f32.mrb[10].mxu0  ;;  %v1233_v24 = vpop.f32.mrb[10].mxu1 }
 0x62c   :  { %v1164_v25 = vpop.f32.mrb[11].mxu0  ;;  %v1235_v29 = vpop.f32.mrb[11].mxu1 }
 0x62d   :  { %v1242_v30 = vcombine.low %v1162_v12, %v1164_v25  ;;  %v1243_v32 = vcombine.low %v1233_v24, %v1235_v29 }
 0x62f   :  { %v1250_v33 = vrot.slane %v1242_v30, %v2829_v61  ;;  %v1257_v34 = vrot.slane %v1243_v32, %v2829_v61 }
 0x631   :  { %v1258_v42 = vcombine.low %v1250_v33, %v1257_v34 }
 0x633   :  { %v1260_v45 = vadd.f32 %v1751_v41, %v1258_v42  ;;  %v1761_v42 = vld [vmem:[%s3145_s0 + $0x38] sm:$0xff] }
 0x635   :  { %v1752_v46 = vmul.f32 -1.442695, %v1260_v45  ;;  %v1268_v3 = vrot.slane %v1260_v45, 2  ;;  %v1279_v49 = vrot.slane %v1260_v45, 6  ;;  %v1276_v55 = vrot.slane %v1260_v45, 4 }
 0x637   :  { %2362 = vpow2.f32 %v1752_v46  ;;  %v1753_v8 = vmul.f32 -1.442695, %v1268_v3  ;;  %v1754_v50 = vmul.f32 -1.442695, %v1279_v49 }
 0x639   :  { %2364 = vpow2.f32 %v1753_v8 }
 0x63a   :  { %2366 = vpow2.f32 %v1754_v50 }
 0x641   :  { %v2363_v54 = vpop.eup %2362 }
 0x642   :  { %v1264_v56 = vadd.f32 1.0, %v2363_v54 }
 0x643   :  { %v2365_v58 = vpop.eup %2364 }
 0x644   :  { %2368 = vrcp.f32 %v1264_v56  ;;  %v1273_v60 = vadd.f32 1.0, %v2365_v58  ;;  %v2367_v62 = vpop.eup %2366 }
 0x645   :  { %2370 = vtanh.f32 %v1276_v55  ;;  %v1284_v11 = vadd.f32 1.0, %v2367_v62 }
 0x646   :  { %2372 = vrcp.f32 %v1273_v60 }
 0x647   :  { %2374 = vrcp.f32 %v1284_v11 }
 0x64e   :  { %v2369_v4 = vpop.eup %2368 }
 0x64f   :  { %v2371_v5 = vpop.eup %2370  ;;  %v1287_v2 = vmul.f32 %v2369_v4, %v3020_v15 }
 0x650   :  { %v2373_v59 = vpop.eup %2372 }
 0x651   :  { %v1288_v14 = vmul.f32 %v2373_v59, %v2371_v5  ;;  %v2375_v19 = vpop.eup %2374 }
 0x653   :  { %v3066_v10 = vadd.f32 %v1288_v14, %v1287_v2 }
 0x655   :  { %2376 = vtanh.f32 %v3066_v10 }
 0x65f   :  { %v2377_v20 = vpop.eup %2376 }
 0x660   :  { %v1291_v12 = vmul.f32 %v2377_v20, %v2375_v19 }
 0x662   :  { %1755 = vst [vmem:[%s3149_s4 + $0xa] sm:$0x3] %v1291_v12  ;;  %1361 = vmatmul.mubr.f32.vlgmr.msra.gmra.mrb[12].mxu0 %v1291_v12  ;;  %1432 = vmatmul.mubr.f32.vlgmr.msra.gmra.mrb[12].mxu1 %v1291_v12 }
 0x663   :  { %2217 = vmatpush1.bf16.msra.mxu0 %v2521_v9  ;;  %2249 = vmatpush1.bf16.msra.mxu1 %v2533_v13 }
 0x664   :  { %2219 = vmatprep.subr.bf16.mxu0 %v2546_v17  ;;  %2251 = vmatprep.subr.bf16.mxu1 %v2548_v18 }
 0x665   :  { %1560 = vmatprep.mubr.f32.mxu0 %v2458_v7  ;;  %1631 = vmatprep.mubr.f32.mxu1 %v2458_v7 }
 0x667   :  { %2221 = vmatpush1.bf16.msra.mxu0 %v2560_v22  ;;  %2253 = vmatpush1.bf16.msra.mxu1 %v2573_v26 }
 0x668   :  { %2223 = vmatprep.subr.bf16.mxu0 %v2575_v27  ;;  %2255 = vmatprep.subr.bf16.mxu1 %v2586_v31  ;;  %v1756_v31 = vld [vmem:[%s3145_s0 + $0x30] sm:$0xff]  ;;  %s2460_s0 = smov [#allocation4]  }
 0x669   :  { %s1714_s9 = sshll.u32 %s2460_s0, 4  ;;  %s1715_s9 = int_to_ptr.vmem [resolvable:$true] %s1714_s9 }
 0x66a   :  { %s2410_s10 = scalar_lea.vmem %s1715_s9, 32  ;;  %p2415_p1 = scmp.lt.s32.totalorder %s1715_s9, %s1715_s9 }
 0x66b   :  { %2225 = vmatpush1.bf16.msra.mxu0 %v2598_v35  ;;  %2257 = vmatpush1.bf16.msra.mxu1 %v2611_v39  ;;  %p2411_p0 = scmp.ne.s32.totalorder %s1715_s9, %s2410_s10  ;;  %p2416_p2 = scmp.lt.s32.totalorder %s2410_s10, %s2410_s10 }
 0x66c   :  { %2227 = vmatprep.subr.bf16.mxu0 %v2613_v40  ;;  %2259 = vmatprep.subr.bf16.mxu1 %v2625_v44 }
 0x66d   :  { %p2417_p3 = por %p2416_p2, %p2415_p1 }
 0x66f   :  { %2229 = vmatpush1.bf16.msra.mxu0 %v2646_v51  ;;  %2261 = vmatpush1.bf16.msra.mxu1 %v2650_v52  ;;  %p2418_p4 = pnand %p2417_p3, %p2411_p0 }
 0x670   :  { %2231 = vmatprep.subr.bf16.mxu0 %v2652_v53  ;;  %2263 = vmatprep.subr.bf16.mxu1 %v2664_v57 }
 0x673   :  { %2233 = vmatpush1.bf16.msra.mxu0 %v2682_v63  ;;  %2265 = vmatpush1.bf16.msra.mxu1 %v2686_v0 }
 0x674   :  { %2235 = vmatprep.subr.bf16.mxu0 %v2688_v1  ;;  %2267 = vmatprep.subr.bf16.mxu1 %v2700_v6 }
 0x677   :  { %2237 = vmatpush1.bf16.msra.mxu0 %v2718_v16  ;;  %2269 = vmatpush1.bf16.msra.mxu1 %v2728_v21 }
 0x678   :  { %2239 = vmatprep.subr.bf16.mxu0 %v2730_v23  ;;  %2271 = vmatprep.subr.bf16.mxu1 %v2739_v28 }
 0x67b   :  { %2241 = vmatpush1.bf16.msra.mxu0 %v2757_v36  ;;  %2273 = vmatpush1.bf16.msra.mxu1 %v2761_v37 }
 0x67c   :  { %2243 = vmatprep.subr.bf16.mxu0 %v2763_v38  ;;  %2275 = vmatprep.subr.bf16.mxu1 %v2772_v43 }
 0x67f   :  { %2245 = vmatpush1.bf16.msra.mxu0 %v2781_v47  ;;  %2277 = vmatpush1.bf16.msra.mxu1 %v2785_v48 }
 0x735   :  { %v1362_v7 = vpop.f32.mrb[12].mxu0  ;;  %v1433_v9 = vpop.f32.mrb[12].mxu1 }
 0x736   :  { %v1364_v13 = vpop.f32.mrb[13].mxu0  ;;  %v1435_v17 = vpop.f32.mrb[13].mxu1 }
 0x737   :  { %v1442_v18 = vcombine.low %v1362_v7, %v1364_v13  ;;  %v1443_v22 = vcombine.low %v1433_v9, %v1435_v17 }
 0x739   :  { %v1450_v26 = vrot.slane %v1442_v18, %v2829_v61  ;;  %v1457_v27 = vrot.slane %v1443_v22, %v2829_v61 }
 0x73b   :  { %v1458_v35 = vcombine.low %v1450_v26, %v1457_v27 }
 0x73d   :  { %v1460_v39 = vadd.f32 %v1756_v31, %v1458_v35 }
 0x73f   :  { %v1757_v40 = vmul.f32 -1.442695, %v1460_v39  ;;  %v1468_v44 = vrot.slane %v1460_v39, 2  ;;  %v1479_v52 = vrot.slane %v1460_v39, 6  ;;  %v1476_v63 = vrot.slane %v1460_v39, 4 }
 0x741   :  { %2378 = vpow2.f32 %v1757_v40  ;;  %v1758_v51 = vmul.f32 -1.442695, %v1468_v44  ;;  %v1759_v53 = vmul.f32 -1.442695, %v1479_v52 }
 0x743   :  { %2380 = vpow2.f32 %v1758_v51 }
 0x744   :  { %2382 = vpow2.f32 %v1759_v53 }
 0x74b   :  { %v2379_v57 = vpop.eup %2378 }
 0x74c   :  { %v1464_v0 = vadd.f32 1.0, %v2379_v57 }
 0x74d   :  { %v2381_v1 = vpop.eup %2380 }
 0x74e   :  { %2384 = vrcp.f32 %v1464_v0  ;;  %v1473_v6 = vadd.f32 1.0, %v2381_v1  ;;  %v2383_v16 = vpop.eup %2382 }
 0x74f   :  { %2386 = vtanh.f32 %v1476_v63  ;;  %v1484_v36 = vadd.f32 1.0, %v2383_v16 }
 0x750   :  { %2388 = vrcp.f32 %v1473_v6 }
 0x751   :  { %2390 = vrcp.f32 %v1484_v36 }
 0x758   :  { %v2385_v21 = vpop.eup %2384 }
 0x759   :  { %v2387_v23 = vpop.eup %2386  ;;  %v1487_v37 = vmul.f32 %v2385_v21, %v3066_v10 }
 0x75a   :  { %v2389_v28 = vpop.eup %2388 }
 0x75b   :  { %v1488_v38 = vmul.f32 %v2389_v28, %v2387_v23  ;;  %v2391_v47 = vpop.eup %2390 }
 0x75d   :  { %v1489_v43 = vadd.f32 %v1488_v38, %v1487_v37 }
 0x75f   :  { %2392 = vtanh.f32 %v1489_v43 }
 0x769   :  { %v2393_v48 = vpop.eup %2392 }
 0x76a   :  { %v1491_v15 = vmul.f32 %v2393_v48, %v2391_v47 }
 0x76c   :  { %1760 = vst [vmem:[%s3149_s4 + $0xc] sm:$0x3] %v1491_v15  ;;  %1561 = vmatmul.mubr.f32.vlgmr.msra.gmra.mrb[14].mxu0 %v1491_v15  ;;  %1632 = vmatmul.mubr.f32.vlgmr.msra.gmra.mrb[14].mxu1 %v1491_v15 }
 0x83f   :  { %v1562_v24 = vpop.f32.mrb[14].mxu0  ;;  %v1633_v25 = vpop.f32.mrb[14].mxu1 }
 0x840   :  { %v1564_v29 = vpop.f32.mrb[15].mxu0  ;;  %v1635_v30 = vpop.f32.mrb[15].mxu1 }
 0x841   :  { %v1642_v32 = vcombine.low %v1562_v24, %v1564_v29  ;;  %v1643_v33 = vcombine.low %v1633_v25, %v1635_v30 }
 0x843   :  { %v1650_v34 = vrot.slane %v1642_v32, %v2829_v61  ;;  %v1657_v41 = vrot.slane %v1643_v33, %v2829_v61 }
 0x845   :  { %v1658_v45 = vcombine.low %v1650_v34, %v1657_v41 }
 0x847   :  { %v1660_v46 = vadd.f32 %v1761_v42, %v1658_v45 }
 0x849   :  { %v1762_v3 = vmul.f32 -1.442695, %v1660_v46  ;;  %v1668_v8 = vrot.slane %v1660_v46, 2  ;;  %v1679_v50 = vrot.slane %v1660_v46, 6  ;;  %v1676_v56 = vrot.slane %v1660_v46, 4 }
 0x84b   :  { %2394 = vpow2.f32 %v1762_v3  ;;  %v1763_v49 = vmul.f32 -1.442695, %v1668_v8  ;;  %v1764_v54 = vmul.f32 -1.442695, %v1679_v50 }
 0x84d   :  { %2396 = vpow2.f32 %v1763_v49 }
 0x84e   :  { %2398 = vpow2.f32 %v1764_v54 }
 0x855   :  { %v2395_v55 = vpop.eup %2394 }
 0x856   :  { %v1664_v58 = vadd.f32 1.0, %v2395_v55 }
 0x857   :  { %v2397_v60 = vpop.eup %2396 }
 0x858   :  { %2400 = vrcp.f32 %v1664_v58  ;;  %v1673_v61 = vadd.f32 1.0, %v2397_v60  ;;  %v2399_v62 = vpop.eup %2398 }
 0x859   :  { %2402 = vtanh.f32 %v1676_v56  ;;  %v1684_v11 = vadd.f32 1.0, %v2399_v62 }
 0x85a   :  { %2404 = vrcp.f32 %v1673_v61 }
 0x85b   :  { %2406 = vrcp.f32 %v1684_v11 }
 0x862   :  { %v2401_v4 = vpop.eup %2400 }
 0x863   :  { %v2403_v5 = vpop.eup %2402  ;;  %v1687_v2 = vmul.f32 %v2401_v4, %v1489_v43 }
 0x864   :  { %v2405_v59 = vpop.eup %2404 }
 0x865   :  { %v1688_v14 = vmul.f32 %v2405_v59, %v2403_v5 }
 0x867   :  { %v1689_v10 = vadd.f32 %v1688_v14, %v1687_v2 }
 0x869   :  { %2408 = vtanh.f32 %v1689_v10  ;;  %1695 = vst [vmem:[#allocation4] sm:$0x3] %v1689_v10 }
 0x86a   :  { %2421 = shalt.err (!%p2418_p4)
}
 0x86b   :  { %s2422_s13 = scalar_lea.hbm %s3151_s6, 32 }
 0x86c   :  { %p2423_p5 = scmp.ne.s32.totalorder %s3151_s6, %s2422_s13  ;;  %p2426_p6 = scmp.lt.u32.totalorder %s2422_s13, %s3151_s6 }
 0x86e   :  { %p2428_p7 = pnand %p2426_p6, %p2423_p5 }
 0x870   :  { %2431 = shalt.err (!%p2428_p7)
}
 0x871   :  { %1717 = dma.vmem_to_hbm [thread:$0]  %s1715_s9, 32, %s3151_s6, [#allocation5]   ;;  %v2407_v19 = vpop.eup %2406 }
 0x872   :  { %s2461_s1 = smov [#allocation2]  }
 0x873   :  { %s1704_s20 = sshll.u32 %s2461_s1, 4  ;;  %v2409_v20 = vpop.eup %2408  ;;  %s1705_s20 = int_to_ptr.vmem [resolvable:$true] %s1704_s20 }
 0x874   :  { %v1691_v12 = vmul.f32 %v2409_v20, %v2407_v19  ;;  %s2432_s23 = scalar_lea.vmem %s1705_s20, 32  ;;  %p2437_p9 = scmp.lt.s32.totalorder %s1705_s20, %s1705_s20 }
 0x875   :  { %p2433_p8 = scmp.ne.s32.totalorder %s1705_s20, %s2432_s23  ;;  %p2438_p10 = scmp.lt.s32.totalorder %s2432_s23, %s2432_s23 }
 0x876   :  { %1765 = vst [vmem:[%s3149_s4 + $0xe] sm:$0x3] %v1691_v12  ;;  %1694 = vst [vmem:[#allocation2] sm:$0x3] %v1691_v12 }
 0x877   :  { %p2439_p11 = por %p2438_p10, %p2437_p9 }
 0x879   :  { %p2440_p12 = pnand %p2439_p11, %p2433_p8 }
 0x87b   :  { %2443 = shalt.err (!%p2440_p12)
}
 0x87c   :  { %s2444_s25 = scalar_lea.hbm %s3150_s5, 32 }
 0x87d   :  { %p2445_p13 = scmp.ne.s32.totalorder %s3150_s5, %s2444_s25  ;;  %p2448_p0 = scmp.lt.u32.totalorder %s2444_s25, %s3150_s5 }
 0x87f   :  { %p2450_p1 = pnand %p2448_p0, %p2445_p13 }
 0x881   :  { %2453 = shalt.err (!%p2450_p1)
}
 0x882   :  { %1707 = dma.vmem_to_hbm [thread:$0]  %s1705_s20, 32, %s3150_s5, [#allocation3]  }
 0x883   :  { %2454 = dma.done.wait [#allocation3], 32  }
 0x884   :  { %2455 = vsyncadd [#allocation3], 4294967264 }
 0x885   :  { %2456 = dma.done.wait [#allocation5], 32  }
 0x886   :  { %2457 = vsyncadd [#allocation5], 4294967264 }
 0x887   :  { %1726 = vsyncpa [#allocation3], 1 }
 0x888   :  { %1727 = vsyncpa [#allocation5], 1 }

</bundles_post_ra>
